<compile_context>
chip_gen: v7x
topology: tpu7x:2x2x1
jax: 0.10.0
libtpu: 0.0.40
codegen_flags: <defaults>
</compile_context>

<pallas_src>
import functools
import re

import jax
import jax.numpy as jnp
import numpy as np
from jax.experimental import pallas as pl
from jax.experimental.pallas import tpu as pltpu

_LANE = 128


def _round_up(n, m):
    return ((n + m - 1) // m) * m


def _tpu_generation():
    """Best-effort TPU generation from device_kind (e.g. 'TPU v6 lite' -> 6)."""
    try:
        kind = jax.devices()[0].device_kind
    except Exception:
        return 0
    m = re.search(r"(\d+)", str(kind))
    return int(m.group(1)) if m else 0


def _mish(v, compute_dtype):
    # mish(x) = x * tanh(softplus(x)) = x * t / (t + 2), t = e*(e+2), e = exp(x).
    # Clamp keeps exp finite; for x > 20 the ratio is 1.0 to f32 precision anyway.
    # Elementwise chain runs in `compute_dtype` (bf16 on v6e/v7x, f32 on v5e);
    # the final scaling of the f32 preactivation stays f32.
    vc = v.astype(compute_dtype)
    e = jnp.exp(jnp.minimum(vc, 20.0))
    t = (e * (e + 2.0)).astype(jnp.float32)
    return v * (t * pl.reciprocal(t + 2.0, approx=True))


def ddpg_actor_kernel(x_ref,
                      w1_ref, b1_ref,
                      w2_ref, b2_ref,
                      w3_ref, b3_ref,
                      w4_ref, b4_ref,
                      o_ref,
                      *, compute_dtype):
    bf16 = jnp.bfloat16
    # x and all weights are bf16 (MXU-native); accumulation + bias adds are f32.
    h1 = _mish(jnp.dot(x_ref[...], w1_ref[...],
                       preferred_element_type=jnp.float32) + b1_ref[...],
               compute_dtype)
    h1_b = h1.astype(bf16)                       # residual held in bf16
    h2 = _mish(jnp.dot(h1_b, w2_ref[...],
                       preferred_element_type=jnp.float32) + b2_ref[...],
               compute_dtype)
    h3 = _mish(jnp.dot(h2.astype(bf16), w3_ref[...],
                       preferred_element_type=jnp.float32) + b3_ref[...],
               compute_dtype)
    h = h3.astype(bf16) + h1_b                   # residual add in bf16
    y = jnp.tanh(jnp.dot(h, w4_ref[...],
                         preferred_element_type=jnp.float32) + b4_ref[...])
    o_ref[...] = y.astype(o_ref.dtype)           # bf16, lane-dense store


def prepare_params(params):
    """One-time weight preparation (call once, NOT per forward pass).

    Casts all weights to bf16 and zero-pads the output layer to a lane-dense
    128-multiple width so the last matmul / writeback use unmasked stores.
    Biases stay f32 (they are added onto the f32 MXU accumulator).
    """
    H = params["w1"].shape[1]
    A = params["w4"].shape[1]
    A_p = _round_up(A, _LANE)
    bf16, f32 = jnp.bfloat16, jnp.float32
    w4 = jnp.zeros((H, A_p), bf16).at[:, :A].set(params["w4"].astype(bf16))
    b4 = jnp.zeros((1, A_p), f32).at[:, :A].set(params["b4"].astype(f32))
    return {
        "w1": params["w1"].astype(bf16),
        "b1": params["b1"].astype(f32),
        "w2": params["w2"].astype(bf16),
        "b2": params["b2"].astype(f32),
        "w3": params["w3"].astype(bf16),
        "b3": params["b3"].astype(f32),
        "w4": w4,
        "b4": b4,
    }


def ddpg_actor_forward(x, prepared, *, n_actions, bm=None):
    """x: [B, obs] f32. prepared: output of prepare_params() (bf16, padded)."""
    B, obs = x.shape
    H = prepared["w1"].shape[1]
    A_p = prepared["w4"].shape[1]
    A = n_actions

    gen = _tpu_generation()
    if bm is None:
        bm = 512 if gen >= 6 else 256            # v5e: M=128 already fills its MXU
    min_tiles = 2 if gen >= 7 else 1             # v7x: shard batch across 2 TCs
    mish_dtype = jnp.bfloat16 if gen >= 6 else jnp.float32

    # --- batch tiling ---
    Bp = _round_up(B, 8)
    if Bp <= bm:
        if min_tiles > 1 and Bp >= 16:
            bm_eff = _round_up(-(-Bp // min_tiles), 8)
            Bp = bm_eff * min_tiles
        else:
            bm_eff = Bp                          # tiny batch: single grid step
    else:
        bm_eff = bm
        Bp = _round_up(B, bm)

    # Only x is touched per call: bf16 cast (+ zero-pad rows only if needed).
    xb = x.astype(jnp.bfloat16)
    if Bp != B:
        xb = jnp.zeros((Bp, obs), jnp.bfloat16).at[:B].set(xb)

    full = lambda shape: pl.BlockSpec(shape, lambda i: (0, 0))
    kernel = functools.partial(ddpg_actor_kernel, compute_dtype=mish_dtype)

    out = pl.pallas_call(
        kernel,
        out_shape=jax.ShapeDtypeStruct((Bp, A_p), jnp.bfloat16),
        grid_spec=pltpu.PrefetchScalarGridSpec(
            num_scalar_prefetch=0,
            grid=(Bp // bm_eff,),
            in_specs=[
                pl.BlockSpec((bm_eff, obs), lambda i: (i, 0)),   # x tile (unpadded K)
                full((obs, H)), full((1, H)),                    # layer 1
                full((H, H)),   full((1, H)),                    # block linear 1
                full((H, H)),   full((1, H)),                    # block linear 2
                full((H, A_p)), full((1, A_p)),                  # output layer (padded)
            ],
            out_specs=pl.BlockSpec((bm_eff, A_p), lambda i: (i, 0)),
        ),
        compiler_params=pltpu.CompilerParams(
            dimension_semantics=("parallel",),     # batch tiles shard across TCs
            vmem_limit_bytes=32 * 1024 * 1024),
    )(xb, prepared["w1"], prepared["b1"], prepared["w2"], prepared["b2"],
      prepared["w3"], prepared["b3"], prepared["w4"], prepared["b4"])

    return out[:B, :A].astype(jnp.float32)


def init_params(key, obs_size, hidden, n_actions):
    ks = jax.random.split(key, 8)
    scale = 0.05
    return {
        "w1": scale * jax.random.normal(ks[0], (obs_size, hidden), jnp.float32),
        "b1": scale * jax.random.normal(ks[1], (1, hidden), jnp.float32),
        "w2": scale * jax.random.normal(ks[2], (hidden, hidden), jnp.float32),
        "b2": scale * jax.random.normal(ks[3], (1, hidden), jnp.float32),
        "w3": scale * jax.random.normal(ks[4], (hidden, hidden), jnp.float32),
        "b3": scale * jax.random.normal(ks[5], (1, hidden), jnp.float32),
        "w4": scale * jax.random.normal(ks[6], (hidden, n_actions), jnp.float32),
        "b4": scale * jax.random.normal(ks[7], (1, n_actions), jnp.float32),
    }


def reference_forward(x, p):
    # Exact f32 reference of the PyTorch module.
    def mish(v):
        return v * jnp.tanh(jax.nn.softplus(v))
    h1 = mish(x @ p["w1"] + p["b1"])
    h2 = mish(h1 @ p["w2"] + p["b2"])
    h3 = mish(h2 @ p["w3"] + p["b3"])
    h = h3 + h1
    return jnp.tanh(h @ p["w4"] + p["b4"])


if __name__ == "__main__":
    obs_size, hidden, n_actions, batch = 32, 512, 4, 8

    key = jax.random.PRNGKey(0)
    kx, kp = jax.random.split(key)
    x = jax.random.normal(kx, (batch, obs_size), jnp.float32)
    params = init_params(kp, obs_size, hidden, n_actions)

    prepared = prepare_params(params)            # one-time weight cast/pad
    fwd = jax.jit(functools.partial(ddpg_actor_forward, n_actions=n_actions))
    out = jax.block_until_ready(fwd(x, prepared))

    ref = jax.block_until_ready(reference_forward(x, params))
    # bf16 matmul operands / activations + approx reciprocal in Mish introduce
    # ~1e-2-level relative deviations; tanh bounds the output so atol dominates.
    np.testing.assert_allclose(np.asarray(out), np.asarray(ref),
                               rtol=5e-2, atol=3e-2)
    print("KERNEL_OK")
</pallas_src>

<mosaic_0001>
module attributes {stable_mosaic.version = 11 : i64} {
  func.func @ddpg_actor_kernel(%arg0: i32, %arg1: memref<8x32xbf16, #tpu.memory_space<vmem>>, %arg2: memref<32x512xbf16, #tpu.memory_space<vmem>>, %arg3: memref<1x512xf32, #tpu.memory_space<vmem>>, %arg4: memref<512x512xbf16, #tpu.memory_space<vmem>>, %arg5: memref<1x512xf32, #tpu.memory_space<vmem>>, %arg6: memref<512x512xbf16, #tpu.memory_space<vmem>>, %arg7: memref<1x512xf32, #tpu.memory_space<vmem>>, %arg8: memref<512x128xbf16, #tpu.memory_space<vmem>>, %arg9: memref<1x128xf32, #tpu.memory_space<vmem>>, %arg10: memref<8x128xbf16, #tpu.memory_space<vmem>>) attributes {dimension_semantics = [#tpu.dimension_semantics<parallel>], iteration_bounds = array<i64: 1>, scalar_prefetch = 0 : i64, scratch_operands = 0 : i64, tpu.core_type = #tpu.core_type<tc>, window_params = [{transform_indices = @transform_0, window_bounds = array<i64: 8, 32>}, {pipeline_mode = #tpu.pipeline_mode<synchronous>, transform_indices = @transform_1, window_bounds = array<i64: 32, 512>}, {pipeline_mode = #tpu.pipeline_mode<synchronous>, transform_indices = @transform_2, window_bounds = array<i64: 1, 512>}, {pipeline_mode = #tpu.pipeline_mode<synchronous>, transform_indices = @transform_3, window_bounds = array<i64: 512, 512>}, {pipeline_mode = #tpu.pipeline_mode<synchronous>, transform_indices = @transform_4, window_bounds = array<i64: 1, 512>}, {pipeline_mode = #tpu.pipeline_mode<synchronous>, transform_indices = @transform_5, window_bounds = array<i64: 512, 512>}, {pipeline_mode = #tpu.pipeline_mode<synchronous>, transform_indices = @transform_6, window_bounds = array<i64: 1, 512>}, {pipeline_mode = #tpu.pipeline_mode<synchronous>, transform_indices = @transform_7, window_bounds = array<i64: 512, 128>}, {pipeline_mode = #tpu.pipeline_mode<synchronous>, transform_indices = @transform_8, window_bounds = array<i64: 1, 128>}, {transform_indices = @transform_9, window_bounds = array<i64: 8, 128>}]} {
    %c0 = arith.constant 0 : index
    %c0_0 = arith.constant 0 : index
    %0 = vector.load %arg1[%c0, %c0_0] : memref<8x32xbf16, #tpu.memory_space<vmem>>, vector<8x32xbf16>
    %c0_1 = arith.constant 0 : index
    %c0_2 = arith.constant 0 : index
    %1 = vector.load %arg2[%c0_1, %c0_2] : memref<32x512xbf16, #tpu.memory_space<vmem>>, vector<32x512xbf16>
    %cst = arith.constant dense<0.000000e+00> : vector<8x512xf32>
    %2 = tpu.matmul %0, %1, %cst {dimension_numbers = #tpu.dot_dimension_numbers<[1], [0], [0], [1], [0, 0, 1, 1], [], []>} : vector<8x32xbf16>, vector<32x512xbf16>, vector<8x512xf32> -> vector<8x512xf32>
    %c0_3 = arith.constant 0 : index
    %c0_4 = arith.constant 0 : index
    %3 = vector.load %arg3[%c0_3, %c0_4] : memref<1x512xf32, #tpu.memory_space<vmem>>, vector<1x512xf32>
    %4 = vector.broadcast %3 : vector<1x512xf32> to vector<8x512xf32>
    %5 = arith.addf %2, %4 : vector<8x512xf32>
    %cst_5 = arith.constant 2.000000e+01 : f32
    %6 = vector.broadcast %cst_5 : f32 to vector<8x512xf32>
    %7 = arith.minimumf %5, %6 : vector<8x512xf32>
    %8 = math.exp %7 : vector<8x512xf32>
    %cst_6 = arith.constant 2.000000e+00 : f32
    %9 = vector.broadcast %cst_6 : f32 to vector<8x512xf32>
    %10 = arith.addf %8, %9 : vector<8x512xf32>
    %11 = arith.mulf %8, %10 : vector<8x512xf32>
    %cst_7 = arith.constant 2.000000e+00 : f32
    %12 = vector.broadcast %cst_7 : f32 to vector<8x512xf32>
    %13 = arith.addf %11, %12 : vector<8x512xf32>
    %14 = tpu.reciprocal %13 {approx = true} : vector<8x512xf32> -> vector<8x512xf32>
    %15 = arith.mulf %11, %14 : vector<8x512xf32>
    %16 = arith.mulf %5, %15 : vector<8x512xf32>
    %17 = arith.truncf %16 : vector<8x512xf32> to vector<8x512xbf16>
    %c0_8 = arith.constant 0 : index
    %c0_9 = arith.constant 0 : index
    %18 = vector.load %arg4[%c0_8, %c0_9] : memref<512x512xbf16, #tpu.memory_space<vmem>>, vector<512x512xbf16>
    %cst_10 = arith.constant dense<0.000000e+00> : vector<8x512xf32>
    %19 = tpu.matmul %17, %18, %cst_10 {dimension_numbers = #tpu.dot_dimension_numbers<[1], [0], [0], [1], [0, 0, 1, 1], [], []>} : vector<8x512xbf16>, vector<512x512xbf16>, vector<8x512xf32> -> vector<8x512xf32>
    %c0_11 = arith.constant 0 : index
    %c0_12 = arith.constant 0 : index
    %20 = vector.load %arg5[%c0_11, %c0_12] : memref<1x512xf32, #tpu.memory_space<vmem>>, vector<1x512xf32>
    %21 = vector.broadcast %20 : vector<1x512xf32> to vector<8x512xf32>
    %22 = arith.addf %19, %21 : vector<8x512xf32>
    %cst_13 = arith.constant 2.000000e+01 : f32
    %23 = vector.broadcast %cst_13 : f32 to vector<8x512xf32>
    %24 = arith.minimumf %22, %23 : vector<8x512xf32>
    %25 = math.exp %24 : vector<8x512xf32>
    %cst_14 = arith.constant 2.000000e+00 : f32
    %26 = vector.broadcast %cst_14 : f32 to vector<8x512xf32>
    %27 = arith.addf %25, %26 : vector<8x512xf32>
    %28 = arith.mulf %25, %27 : vector<8x512xf32>
    %cst_15 = arith.constant 2.000000e+00 : f32
    %29 = vector.broadcast %cst_15 : f32 to vector<8x512xf32>
    %30 = arith.addf %28, %29 : vector<8x512xf32>
    %31 = tpu.reciprocal %30 {approx = true} : vector<8x512xf32> -> vector<8x512xf32>
    %32 = arith.mulf %28, %31 : vector<8x512xf32>
    %33 = arith.mulf %22, %32 : vector<8x512xf32>
    %34 = arith.truncf %33 : vector<8x512xf32> to vector<8x512xbf16>
    %c0_16 = arith.constant 0 : index
    %c0_17 = arith.constant 0 : index
    %35 = vector.load %arg6[%c0_16, %c0_17] : memref<512x512xbf16, #tpu.memory_space<vmem>>, vector<512x512xbf16>
    %cst_18 = arith.constant dense<0.000000e+00> : vector<8x512xf32>
    %36 = tpu.matmul %34, %35, %cst_18 {dimension_numbers = #tpu.dot_dimension_numbers<[1], [0], [0], [1], [0, 0, 1, 1], [], []>} : vector<8x512xbf16>, vector<512x512xbf16>, vector<8x512xf32> -> vector<8x512xf32>
    %c0_19 = arith.constant 0 : index
    %c0_20 = arith.constant 0 : index
    %37 = vector.load %arg7[%c0_19, %c0_20] : memref<1x512xf32, #tpu.memory_space<vmem>>, vector<1x512xf32>
    %38 = vector.broadcast %37 : vector<1x512xf32> to vector<8x512xf32>
    %39 = arith.addf %36, %38 : vector<8x512xf32>
    %cst_21 = arith.constant 2.000000e+01 : f32
    %40 = vector.broadcast %cst_21 : f32 to vector<8x512xf32>
    %41 = arith.minimumf %39, %40 : vector<8x512xf32>
    %42 = math.exp %41 : vector<8x512xf32>
    %cst_22 = arith.constant 2.000000e+00 : f32
    %43 = vector.broadcast %cst_22 : f32 to vector<8x512xf32>
    %44 = arith.addf %42, %43 : vector<8x512xf32>
    %45 = arith.mulf %42, %44 : vector<8x512xf32>
    %cst_23 = arith.constant 2.000000e+00 : f32
    %46 = vector.broadcast %cst_23 : f32 to vector<8x512xf32>
    %47 = arith.addf %45, %46 : vector<8x512xf32>
    %48 = tpu.reciprocal %47 {approx = true} : vector<8x512xf32> -> vector<8x512xf32>
    %49 = arith.mulf %45, %48 : vector<8x512xf32>
    %50 = arith.mulf %39, %49 : vector<8x512xf32>
    %51 = arith.truncf %50 : vector<8x512xf32> to vector<8x512xbf16>
    %52 = arith.addf %51, %17 : vector<8x512xbf16>
    %c0_24 = arith.constant 0 : index
    %c0_25 = arith.constant 0 : index
    %53 = vector.load %arg8[%c0_24, %c0_25] : memref<512x128xbf16, #tpu.memory_space<vmem>>, vector<512x128xbf16>
    %cst_26 = arith.constant dense<0.000000e+00> : vector<8x128xf32>
    %54 = tpu.matmul %52, %53, %cst_26 {dimension_numbers = #tpu.dot_dimension_numbers<[1], [0], [0], [1], [0, 0, 1, 1], [], []>} : vector<8x512xbf16>, vector<512x128xbf16>, vector<8x128xf32> -> vector<8x128xf32>
    %c0_27 = arith.constant 0 : index
    %c0_28 = arith.constant 0 : index
    %55 = vector.load %arg9[%c0_27, %c0_28] : memref<1x128xf32, #tpu.memory_space<vmem>>, vector<1x128xf32>
    %56 = vector.broadcast %55 : vector<1x128xf32> to vector<8x128xf32>
    %57 = arith.addf %54, %56 : vector<8x128xf32>
    %58 = math.tanh %57 : vector<8x128xf32>
    %59 = arith.truncf %58 : vector<8x128xf32> to vector<8x128xbf16>
    %c0_29 = arith.constant 0 : index
    %c0_30 = arith.constant 0 : index
    %60 = vector.load %arg10[%c0_29, %c0_30] : memref<8x128xbf16, #tpu.memory_space<vmem>>, vector<8x128xbf16>
    tpu.vector_store %arg10[%c0_29, %c0_30], %59 {strides = array<i32>} : memref<8x128xbf16, #tpu.memory_space<vmem>>, vector<8x128xbf16>,
    return
  }
  func.func @transform_0(%arg0: i32) -> (i32, i32) {
    %c0_i32 = arith.constant 0 : i32
    %c0_i32_0 = arith.constant 0 : i32
    return %arg0, %c0_i32 : i32, i32
  }
  func.func @transform_1(%arg0: i32) -> (i32, i32) {
    %c0_i32 = arith.constant 0 : i32
    %c0_i32_0 = arith.constant 0 : i32
    %c0_i32_1 = arith.constant 0 : i32
    return %c0_i32, %c0_i32_0 : i32, i32
  }
  func.func @transform_2(%arg0: i32) -> (i32, i32) {
    %c0_i32 = arith.constant 0 : i32
    %c0_i32_0 = arith.constant 0 : i32
    %c0_i32_1 = arith.constant 0 : i32
    return %c0_i32, %c0_i32_0 : i32, i32
  }
  func.func @transform_3(%arg0: i32) -> (i32, i32) {
    %c0_i32 = arith.constant 0 : i32
    %c0_i32_0 = arith.constant 0 : i32
    %c0_i32_1 = arith.constant 0 : i32
    return %c0_i32, %c0_i32_0 : i32, i32
  }
  func.func @transform_4(%arg0: i32) -> (i32, i32) {
    %c0_i32 = arith.constant 0 : i32
    %c0_i32_0 = arith.constant 0 : i32
    %c0_i32_1 = arith.constant 0 : i32
    return %c0_i32, %c0_i32_0 : i32, i32
  }
  func.func @transform_5(%arg0: i32) -> (i32, i32) {
    %c0_i32 = arith.constant 0 : i32
    %c0_i32_0 = arith.constant 0 : i32
    %c0_i32_1 = arith.constant 0 : i32
    return %c0_i32, %c0_i32_0 : i32, i32
  }
  func.func @transform_6(%arg0: i32) -> (i32, i32) {
    %c0_i32 = arith.constant 0 : i32
    %c0_i32_0 = arith.constant 0 : i32
    %c0_i32_1 = arith.constant 0 : i32
    return %c0_i32, %c0_i32_0 : i32, i32
  }
  func.func @transform_7(%arg0: i32) -> (i32, i32) {
    %c0_i32 = arith.constant 0 : i32
    %c0_i32_0 = arith.constant 0 : i32
    %c0_i32_1 = arith.constant 0 : i32
    return %c0_i32, %c0_i32_0 : i32, i32
  }
  func.func @transform_8(%arg0: i32) -> (i32, i32) {
    %c0_i32 = arith.constant 0 : i32
    %c0_i32_0 = arith.constant 0 : i32
    %c0_i32_1 = arith.constant 0 : i32
    return %c0_i32, %c0_i32_0 : i32, i32
  }
  func.func @transform_9(%arg0: i32) -> (i32, i32) {
    %c0_i32 = arith.constant 0 : i32
    %c0_i32_0 = arith.constant 0 : i32
    return %arg0, %c0_i32 : i32, i32
  }
}

</mosaic_0001>

<bundles_post_ra>
// kernel: ddpg_actor_forward.1
= control target key start
LH: loop header
LB: loop body
LE: loop exit
PB: predicated region body
PF: predicated region fallthrough
CT: control target
= control target key end

     0   :  { %14 = vsyncpa [#allocation3], 0  ;;  %s3789_s0 = inlined_call_operand.vmem [shape: bf16[8,32], index: 0, kind: input, shape index: {}]   ;;  %s3790_s1 = inlined_call_operand.hbm [shape: bf16[32,512], index: 1, kind: input, shape index: {}]   ;;  %s3791_s2 = inlined_call_operand.vmem [shape: f32[1,512], index: 2, kind: input, shape index: {}]   ;;  %s3792_s3 = inlined_call_operand.hbm [shape: bf16[512,512], index: 3, kind: input, shape index: {}]   ;;  %s3793_s4 = inlined_call_operand.vmem [shape: f32[1,512], index: 4, kind: input, shape index: {}]   ;;  %s3794_s5 = inlined_call_operand.hbm [shape: bf16[512,512], index: 5, kind: input, shape index: {}]   ;;  %s3795_s6 = inlined_call_operand.vmem [shape: f32[1,512], index: 6, kind: input, shape index: {}]   ;;  %s3796_s7 = inlined_call_operand.hbm [shape: bf16[512,128], index: 7, kind: input, shape index: {}]   ;;  %s3797_s8 = inlined_call_operand.vmem [shape: f32[1,128], index: 8, kind: input, shape index: {}]   ;;  %s3798_s9 = inlined_call_operand.vmem [shape: bf16[8,128], index: 9, kind: output, shape index: {}]  }
   0x1   :  { %15 = vsyncpa [#allocation5], 0 }
   0x2   :  { %16 = vsyncpa [#allocation8], 0  ;;  %s3578_s30 = smov [#allocation4]   ;;  %s3579_s11 = smov [#allocation2]  }
   0x3   :  { %s38_s10 = sshll.u32 %s3578_s30, 4  ;;  %s24_s12 = sshll.u32 %s3579_s11, 4  ;;  %s39_s10 = int_to_ptr.vmem [resolvable:$true] %s38_s10  ;;  %s3637_s12 = int_to_ptr.vmem [resolvable:$true] %s24_s12 }
   0x4   :  { %s3484_s15 = scalar_lea.hbm %s3792_s3, 16384 }
   0x5   :  { %p3485_p0 = scmp.ne.s32.totalorder %s3792_s3, %s3484_s15  ;;  %p3488_p1 = scmp.lt.u32.totalorder %s3484_s15, %s3792_s3 }
   0x7   :  { %p3490_p2 = pnand %p3488_p1, %p3485_p0 }
   0x9   :  { %3493 = shalt.err (!%p3490_p2)
}
   0xa   :  { %s3494_s20 = scalar_lea.vmem %s39_s10, 16384  ;;  %p3499_p4 = scmp.lt.s32.totalorder %s39_s10, %s39_s10 }
   0xb   :  { %p3495_p3 = scmp.ne.s32.totalorder %s39_s10, %s3494_s20  ;;  %p3500_p5 = scmp.lt.s32.totalorder %s3494_s20, %s3494_s20 }
   0xd   :  { %p3501_p6 = por %p3500_p5, %p3499_p4 }
   0xf   :  { %p3502_p7 = pnand %p3501_p6, %p3495_p3 }
  0x11   :  { %3505 = shalt.err (!%p3502_p7)
}
  0x12   :  { %s3580_s21 = smov 256   ;;  %s3581_s22 = smov 16  }
  0x13   :  { %44 = dma.hbm_to_vmem [thread:$0]  %s3792_s3, 16384, %s39_s10, [#allocation5], %s3580_s21, %s3580_s21, %s3581_s22  }
  0x14   :  { %s3506_s27 = scalar_lea.hbm %s3790_s1, 1024 }
  0x15   :  { %p3507_p8 = scmp.ne.s32.totalorder %s3790_s1, %s3506_s27  ;;  %p3510_p9 = scmp.lt.u32.totalorder %s3506_s27, %s3790_s1 }
  0x17   :  { %p3512_p10 = pnand %p3510_p9, %p3507_p8 }
  0x19   :  { %3515 = shalt.err (!%p3512_p10)
}
  0x1a   :  { %s3516_s13 = scalar_lea.vmem %s3637_s12, 1024  ;;  %p3521_p12 = scmp.lt.s32.totalorder %s3637_s12, %s3637_s12 }
  0x1b   :  { %p3517_p11 = scmp.ne.s32.totalorder %s3637_s12, %s3516_s13  ;;  %p3522_p13 = scmp.lt.s32.totalorder %s3516_s13, %s3516_s13 }
  0x1d   :  { %p3523_p0 = por %p3522_p13, %p3521_p12 }
  0x1f   :  { %p3524_p1 = pnand %p3523_p0, %p3517_p11 }
  0x21   :  { %3527 = shalt.err (!%p3524_p1)
}
  0x22   :  { %30 = dma.hbm_to_vmem [thread:$0]  %s3790_s1, 1024, %s3637_s12, [#allocation3], %s3580_s21, %s3580_s21, %s3581_s22  }
  0x23   :  { %s3582_s14 = smov [#allocation6]   ;;  %s3583_s16 = smov [#allocation7]  }
  0x24   :  { %s52_s15 = sshll.u32 %s3582_s14, 4  ;;  %s66_s17 = sshll.u32 %s3583_s16, 4  ;;  %s53_s15 = int_to_ptr.vmem [resolvable:$true] %s52_s15  ;;  %s3674_s17 = int_to_ptr.vmem [resolvable:$true] %s66_s17 }
  0x25   :  { %s3528_s20 = scalar_lea.hbm %s3794_s5, 16384 }
  0x26   :  { %p3529_p2 = scmp.ne.s32.totalorder %s3794_s5, %s3528_s20  ;;  %p3532_p3 = scmp.lt.u32.totalorder %s3528_s20, %s3794_s5 }
  0x28   :  { %p3534_p4 = pnand %p3532_p3, %p3529_p2 }
  0x2a   :  { %3537 = shalt.err (!%p3534_p4)
}
  0x2b   :  { %s3538_s1 = scalar_lea.vmem %s53_s15, 16384  ;;  %p3543_p6 = scmp.lt.s32.totalorder %s53_s15, %s53_s15 }
  0x2c   :  { %p3539_p5 = scmp.ne.s32.totalorder %s53_s15, %s3538_s1  ;;  %p3544_p7 = scmp.lt.s32.totalorder %s3538_s1, %s3538_s1 }
  0x2e   :  { %p3545_p8 = por %p3544_p7, %p3543_p6 }
  0x30   :  { %p3546_p9 = pnand %p3545_p8, %p3539_p5 }
  0x32   :  { %3549 = shalt.err (!%p3546_p9)
}
  0x33   :  { %58 = dma.hbm_to_vmem [thread:$0]  %s3794_s5, 16384, %s53_s15, [#allocation5], %s3580_s21, %s3580_s21, %s3581_s22  }
  0x34   :  { %s3550_s30 = scalar_lea.hbm %s3796_s7, 4096 }
  0x35   :  { %p3551_p10 = scmp.ne.s32.totalorder %s3796_s7, %s3550_s30  ;;  %p3554_p11 = scmp.lt.u32.totalorder %s3550_s30, %s3796_s7 }
  0x37   :  { %p3556_p12 = pnand %p3554_p11, %p3551_p10 }
  0x39   :  { %3559 = shalt.err (!%p3556_p12)
}
  0x3a   :  { %s3560_s14 = scalar_lea.vmem %s3674_s17, 4096  ;;  %p3565_p0 = scmp.lt.s32.totalorder %s3674_s17, %s3674_s17 }
  0x3b   :  { %p3561_p13 = scmp.ne.s32.totalorder %s3674_s17, %s3560_s14  ;;  %p3566_p1 = scmp.lt.s32.totalorder %s3560_s14, %s3560_s14 }
  0x3d   :  { %p3567_p2 = por %p3566_p1, %p3565_p0 }
  0x3f   :  { %p3568_p3 = pnand %p3567_p2, %p3561_p13 }
  0x41   :  { %3571 = shalt.err (!%p3568_p3)
}
  0x42   :  { %s3584_s5 = smov 64   ;;  %s3585_s21 = smov 4  }
  0x43   :  { %72 = dma.hbm_to_vmem [thread:$0]  %s3796_s7, 4096, %s3674_s17, [#allocation8], %s3584_s5, %s3584_s5, %s3585_s21  }
  0x44   :  { %3572 = dma.done.wait [#allocation3], 1024  }
  0x45   :  { %3573 = vsyncadd [#allocation3], 4294966272 }
  0x46   :  { %3574 = dma.done.wait [#allocation5], 32768  }
  0x47   :  { %3575 = vsyncadd [#allocation5], 4294934528 }
  0x48   :  { %3576 = dma.done.wait [#allocation8], 4096  }
  0x49   :  { %3577 = vsyncadd [#allocation8], 4294963200  ;;  %v3586_v0 = vmov 0   ;;  %v3006_v1 = vld [vmem:[#allocation2 + $0x4] ss:$16 sps:$4 sm:$0xff]   ;;  %vm159_vm0 = vcmask 261120  }
  0x4a   :  { %195 = vmatprep.mubr.bf16.mxu0 %v3586_v0  ;;  %236 = vmatprep.mubr.bf16.mxu1 %v3586_v0  ;;  %v3008_v2 = vld [vmem:[#allocation2] ss:$16 sps:$4 sm:$0xff]   ;;  %v3009_v3 = vld [vmem:[#allocation2 + $0x24] ss:$16 sps:$4 sm:$0xff]   ;;  %v3012_v5 = vld [vmem:[#allocation2 + $0xc] ss:$16 sps:$4 sm:$0xff]  }
  0x4b   :  { %163 = vmatprep.subr.bf16.mxu0 %v3006_v1  ;;  %v3011_v4 = vld [vmem:[#allocation2 + $0x20] ss:$16 sps:$4 sm:$0xff]   ;;  %v3014_v6 = vld [vmem:[#allocation2 + $0x8] ss:$16 sps:$4 sm:$0xff]   ;;  %204 = vmatprep.subr.bf16.mxu1 %v3012_v5  ;;  %v3015_v8 = vld [vmem:[#allocation2 + $0x2c] ss:$16 sps:$4 sm:$0xff]  }
  0x4c   :  { %164 = vmatpush1.bf16.msra.mxu0 %v3008_v2  ;;  %v88_v7 = vld [vmem:[%s3789_s0] sm:$0xf]  ;;  %205 = vmatpush1.bf16.msra.mxu1 %v3014_v6  ;;  %v3017_v9 = vld [vmem:[#allocation2 + $0x28] ss:$16 sps:$4 sm:$0xff]   ;;  %v3020_v10 = vld [vmem:[#allocation4 + $0x4] ss:$16 sps:$4 sm:$0xff]  }
  0x4d   :  { %165 = vmatprep.subr.bf16.mxu0 %v3009_v3  ;;  %206 = vmatprep.subr.bf16.mxu1 %v3015_v8  ;;  %v3018_v11 = vld [vmem:[#allocation4] ss:$16 sps:$4 sm:$0xff]   ;;  %v3023_v12 = vld [vmem:[#allocation4 + $0xc] ss:$16 sps:$4 sm:$0xff]   ;;  %v3026_v13 = vld [vmem:[#allocation4 + $0x24] ss:$16 sps:$4 sm:$0xff]  }
  0x4e   :  { %v3021_v14 = vld [vmem:[#allocation4 + $0x8] ss:$16 sps:$4 sm:$0xff]   ;;  %v3024_v15 = vld [vmem:[#allocation4 + $0x20] ss:$16 sps:$4 sm:$0xff]   ;;  %v3029_v16 = vld [vmem:[#allocation4 + $0x2c] ss:$16 sps:$4 sm:$0xff]  }
  0x4f   :  { %v3032_v17 = vld [vmem:[#allocation4 + $0x44] ss:$16 sps:$4 sm:$0xff]   ;;  %v3027_v18 = vld [vmem:[#allocation4 + $0x28] ss:$16 sps:$4 sm:$0xff]   ;;  %v3030_v19 = vld [vmem:[#allocation4 + $0x40] ss:$16 sps:$4 sm:$0xff]  }
  0x50   :  { %166 = vmatpush1.bf16.msra.mxu0 %v3011_v4  ;;  %207 = vmatpush1.bf16.msra.mxu1 %v3017_v9  ;;  %v3035_v20 = vld [vmem:[#allocation4 + $0x4c] ss:$16 sps:$4 sm:$0xff]   ;;  %v3038_v21 = vld [vmem:[#allocation4 + $0x64] ss:$16 sps:$4 sm:$0xff]   ;;  %v3033_v22 = vld [vmem:[#allocation4 + $0x48] ss:$16 sps:$4 sm:$0xff]  }
  0x51   :  { %1075 = vmatprep.subr.bf16.mxu0 %v3020_v10  ;;  %1157 = vmatprep.subr.bf16.mxu1 %v3023_v12  ;;  %v3036_v23 = vld [vmem:[#allocation4 + $0x60] ss:$16 sps:$4 sm:$0xff]   ;;  %v3041_v24 = vld [vmem:[#allocation4 + $0x6c] ss:$16 sps:$4 sm:$0xff]   ;;  %v3044_v25 = vld [vmem:[#allocation4 + $0x84] ss:$16 sps:$4 sm:$0xff]   ;;  %v99_v12 = vlaneseq }
  0x52   :  { %v3039_v26 = vld [vmem:[#allocation4 + $0x68] ss:$16 sps:$4 sm:$0xff]   ;;  %v3042_v27 = vld [vmem:[#allocation4 + $0x80] ss:$16 sps:$4 sm:$0xff]   ;;  %v3047_v28 = vld [vmem:[#allocation4 + $0x8c] ss:$16 sps:$4 sm:$0xff]  }
  0x53   :  { %2638 = vmatmul.mubr.msk.bf16.vlgmr.msra.gmra.mrb[0].mxu0 %vm159_vm0, %v88_v7  ;;  %2639 = vmatmul.mubr.msk.bf16.vlgmr.msra.gmra.mrb[0].mxu1 %vm159_vm0, %v88_v7  ;;  %v3050_v29 = vld [vmem:[#allocation4 + $0xa4] ss:$16 sps:$4 sm:$0xff]   ;;  %v3045_v30 = vld [vmem:[#allocation4 + $0x88] ss:$16 sps:$4 sm:$0xff]   ;;  %v3048_v31 = vld [vmem:[#allocation4 + $0xa0] ss:$16 sps:$4 sm:$0xff]  }
  0x54   :  { %1076 = vmatpush1.bf16.msra.mxu0 %v3018_v11  ;;  %1158 = vmatpush1.bf16.msra.mxu1 %v3021_v14  ;;  %v3053_v32 = vld [vmem:[#allocation4 + $0xac] ss:$16 sps:$4 sm:$0xff]   ;;  %v3051_v33 = vld [vmem:[#allocation4 + $0xa8] ss:$16 sps:$4 sm:$0xff]   ;;  %v3056_v34 = vld [vmem:[#allocation4 + $0xc4] ss:$16 sps:$4 sm:$0xff]  }
  0x55   :  { %1077 = vmatprep.subr.bf16.mxu0 %v3026_v13  ;;  %1159 = vmatprep.subr.bf16.mxu1 %v3029_v16  ;;  %v3059_v35 = vld [vmem:[#allocation4 + $0xcc] ss:$16 sps:$4 sm:$0xff]   ;;  %v3054_v36 = vld [vmem:[#allocation4 + $0xc0] ss:$16 sps:$4 sm:$0xff]   ;;  %v3057_v37 = vld [vmem:[#allocation4 + $0xc8] ss:$16 sps:$4 sm:$0xff]  }
  0x56   :  { %v3062_v38 = vld [vmem:[#allocation4 + $0xe4] ss:$16 sps:$4 sm:$0xff]   ;;  %v3065_v39 = vld [vmem:[#allocation4 + $0xec] ss:$16 sps:$4 sm:$0xff]   ;;  %v3060_v40 = vld [vmem:[#allocation4 + $0xe0] ss:$16 sps:$4 sm:$0xff]  }
  0x57   :  { %v3063_v41 = vld [vmem:[#allocation4 + $0xe8] ss:$16 sps:$4 sm:$0xff]   ;;  %v3068_v42 = vld [vmem:[#allocation4 + $0x104] ss:$16 sps:$4 sm:$0xff]   ;;  %v3071_v43 = vld [vmem:[#allocation4 + $0x10c] ss:$16 sps:$4 sm:$0xff]  }
  0x58   :  { %1078 = vmatpush1.bf16.msra.mxu0 %v3024_v15  ;;  %1160 = vmatpush1.bf16.msra.mxu1 %v3027_v18  ;;  %v3066_v44 = vld [vmem:[#allocation4 + $0x100] ss:$16 sps:$4 sm:$0xff]   ;;  %v3069_v45 = vld [vmem:[#allocation4 + $0x108] ss:$16 sps:$4 sm:$0xff]   ;;  %v3074_v46 = vld [vmem:[#allocation4 + $0x124] ss:$16 sps:$4 sm:$0xff]  }
  0x59   :  { %1079 = vmatprep.subr.bf16.mxu0 %v3032_v17  ;;  %1161 = vmatprep.subr.bf16.mxu1 %v3035_v20  ;;  %v3077_v47 = vld [vmem:[#allocation4 + $0x12c] ss:$16 sps:$4 sm:$0xff]   ;;  %v3072_v48 = vld [vmem:[#allocation4 + $0x120] ss:$16 sps:$4 sm:$0xff]   ;;  %v3075_v49 = vld [vmem:[#allocation4 + $0x128] ss:$16 sps:$4 sm:$0xff]  }
  0x5a   :  { %v3080_v50 = vld [vmem:[#allocation4 + $0x144] ss:$16 sps:$4 sm:$0xff]   ;;  %v3083_v51 = vld [vmem:[#allocation4 + $0x14c] ss:$16 sps:$4 sm:$0xff]   ;;  %v3078_v52 = vld [vmem:[#allocation4 + $0x140] ss:$16 sps:$4 sm:$0xff]  }
  0x5b   :  { %v3081_v53 = vld [vmem:[#allocation4 + $0x148] ss:$16 sps:$4 sm:$0xff]   ;;  %v3086_v54 = vld [vmem:[#allocation4 + $0x164] ss:$16 sps:$4 sm:$0xff]   ;;  %v3089_v55 = vld [vmem:[#allocation4 + $0x16c] ss:$16 sps:$4 sm:$0xff]  }
  0x5c   :  { %1080 = vmatpush1.bf16.msra.mxu0 %v3030_v19  ;;  %1162 = vmatpush1.bf16.msra.mxu1 %v3033_v22  ;;  %v3084_v56 = vld [vmem:[#allocation4 + $0x160] ss:$16 sps:$4 sm:$0xff]   ;;  %v3087_v57 = vld [vmem:[#allocation4 + $0x168] ss:$16 sps:$4 sm:$0xff]   ;;  %v3092_v58 = vld [vmem:[#allocation4 + $0x184] ss:$16 sps:$4 sm:$0xff]  }
  0x5d   :  { %1081 = vmatprep.subr.bf16.mxu0 %v3038_v21  ;;  %1163 = vmatprep.subr.bf16.mxu1 %v3041_v24  ;;  %v3095_v59 = vld [vmem:[#allocation4 + $0x18c] ss:$16 sps:$4 sm:$0xff]   ;;  %v3090_v60 = vld [vmem:[#allocation4 + $0x180] ss:$16 sps:$4 sm:$0xff]   ;;  %v3093_v61 = vld [vmem:[#allocation4 + $0x188] ss:$16 sps:$4 sm:$0xff]  }
  0x5e   :  { %v3098_v62 = vld [vmem:[#allocation4 + $0x1a4] ss:$16 sps:$4 sm:$0xff]   ;;  %v3101_v63 = vld [vmem:[#allocation4 + $0x1ac] ss:$16 sps:$4 sm:$0xff]   ;;  %v3096_v0 = vld [vmem:[#allocation4 + $0x1a0] ss:$16 sps:$4 sm:$0xff]  }
  0x5f   :  { %v3099_v1 = vld [vmem:[#allocation4 + $0x1a8] ss:$16 sps:$4 sm:$0xff]   ;;  %v3104_v2 = vld [vmem:[#allocation4 + $0x1c4] ss:$16 sps:$4 sm:$0xff]   ;;  %v3107_v3 = vld [vmem:[#allocation4 + $0x1cc] ss:$16 sps:$4 sm:$0xff]  }
  0x60   :  { %1082 = vmatpush1.bf16.msra.mxu0 %v3036_v23  ;;  %1164 = vmatpush1.bf16.msra.mxu1 %v3039_v26  ;;  %v3102_v4 = vld [vmem:[#allocation4 + $0x1c0] ss:$16 sps:$4 sm:$0xff]   ;;  %v3105_v5 = vld [vmem:[#allocation4 + $0x1c8] ss:$16 sps:$4 sm:$0xff]   ;;  %v3110_v6 = vld [vmem:[#allocation4 + $0x1e4] ss:$16 sps:$4 sm:$0xff]  }
  0x61   :  { %1083 = vmatprep.subr.bf16.mxu0 %v3044_v25  ;;  %1165 = vmatprep.subr.bf16.mxu1 %v3047_v28  ;;  %v3113_v7 = vld [vmem:[#allocation4 + $0x1ec] ss:$16 sps:$4 sm:$0xff]   ;;  %v3108_v8 = vld [vmem:[#allocation4 + $0x1e0] ss:$16 sps:$4 sm:$0xff]   ;;  %v3111_v9 = vld [vmem:[#allocation4 + $0x1e8] ss:$16 sps:$4 sm:$0xff]  }
  0x62   :  { %v3116_v10 = vld [vmem:[#allocation4 + $0x204] ss:$16 sps:$4 sm:$0xff]   ;;  %v3119_v11 = vld [vmem:[#allocation4 + $0x20c] ss:$16 sps:$4 sm:$0xff]   ;;  %v100_v13 = vshrl.u32 %v99_v12, 7 }
  0x63   :  { %v3716_v15 = vld [vmem:[%s3791_s2] sm:$0xf]  ;;  %v3137_v12 = vld [vmem:[#allocation4 + $0x26c] ss:$16 sps:$4 sm:$0xff]  }
  0x64   :  { %1084 = vmatpush1.bf16.msra.mxu0 %v3042_v27  ;;  %1166 = vmatpush1.bf16.msra.mxu1 %v3045_v30  ;;  %v3711_v14 = vsub.s32 0, %v100_v13  ;;  %v3718_v16 = vsub.s32 1, %v100_v13  ;;  %v3722_v18 = vsub.s32 3, %v100_v13 }
  0x65   :  { %1085 = vmatprep.subr.bf16.mxu0 %v3050_v29  ;;  %1167 = vmatprep.subr.bf16.mxu1 %v3053_v32 }
  0x66   :  { %v102_v17 = vrot.slane %v3716_v15, %v3711_v14  ;;  %v106_v19 = vrot.slane %v3716_v15, %v3718_v16  ;;  %v114_v23 = vrot.slane %v3716_v15, %v3722_v18 }
  0x68   :  { %1086 = vmatpush1.bf16.msra.mxu0 %v3048_v31  ;;  %1168 = vmatpush1.bf16.msra.mxu1 %v3051_v33 }
  0x69   :  { %1087 = vmatprep.subr.bf16.mxu0 %v3056_v34  ;;  %1169 = vmatprep.subr.bf16.mxu1 %v3059_v35 }
  0x6c   :  { %1088 = vmatpush1.bf16.msra.mxu0 %v3054_v36  ;;  %1170 = vmatpush1.bf16.msra.mxu1 %v3057_v37 }
  0x6d   :  { %1089 = vmatprep.subr.bf16.mxu0 %v3062_v38  ;;  %1171 = vmatprep.subr.bf16.mxu1 %v3065_v39 }
  0x70   :  { %1090 = vmatpush1.bf16.msra.mxu0 %v3060_v40  ;;  %1172 = vmatpush1.bf16.msra.mxu1 %v3063_v41 }
  0x71   :  { %1091 = vmatprep.subr.bf16.mxu0 %v3068_v42  ;;  %1173 = vmatprep.subr.bf16.mxu1 %v3071_v43 }
  0x74   :  { %1092 = vmatpush1.bf16.msra.mxu0 %v3066_v44  ;;  %1174 = vmatpush1.bf16.msra.mxu1 %v3069_v45 }
  0x75   :  { %1093 = vmatprep.subr.bf16.mxu0 %v3074_v46  ;;  %1175 = vmatprep.subr.bf16.mxu1 %v3077_v47 }
  0x78   :  { %1094 = vmatpush1.bf16.msra.mxu0 %v3072_v48  ;;  %1176 = vmatpush1.bf16.msra.mxu1 %v3075_v49 }
  0x79   :  { %1095 = vmatprep.subr.bf16.mxu0 %v3080_v50  ;;  %1177 = vmatprep.subr.bf16.mxu1 %v3083_v51 }
  0x7c   :  { %1096 = vmatpush1.bf16.msra.mxu0 %v3078_v52  ;;  %1178 = vmatpush1.bf16.msra.mxu1 %v3081_v53 }
  0x7d   :  { %1097 = vmatprep.subr.bf16.mxu0 %v3086_v54  ;;  %1179 = vmatprep.subr.bf16.mxu1 %v3089_v55 }
  0x80   :  { %1098 = vmatpush1.bf16.msra.mxu0 %v3084_v56  ;;  %1180 = vmatpush1.bf16.msra.mxu1 %v3087_v57  ;;  %v3728_v57 = vsub.s32 2, %v100_v13 }
  0x81   :  { %1099 = vmatprep.subr.bf16.mxu0 %v3092_v58  ;;  %1181 = vmatprep.subr.bf16.mxu1 %v3095_v59 }
  0x84   :  { %1100 = vmatpush1.bf16.msra.mxu0 %v3090_v60  ;;  %1182 = vmatpush1.bf16.msra.mxu1 %v3093_v61  ;;  %v3114_v60 = vld [vmem:[#allocation4 + $0x200] ss:$16 sps:$4 sm:$0xff]   ;;  %v3117_v61 = vld [vmem:[#allocation4 + $0x208] ss:$16 sps:$4 sm:$0xff]  }
  0x85   :  { %1101 = vmatprep.subr.bf16.mxu0 %v3098_v62  ;;  %1183 = vmatprep.subr.bf16.mxu1 %v3101_v63 }
  0x88   :  { %1102 = vmatpush1.bf16.msra.mxu0 %v3096_v0  ;;  %1184 = vmatpush1.bf16.msra.mxu1 %v3099_v1  ;;  %v3122_v0 = vld [vmem:[#allocation4 + $0x224] ss:$16 sps:$4 sm:$0xff]   ;;  %v3125_v1 = vld [vmem:[#allocation4 + $0x22c] ss:$16 sps:$4 sm:$0xff]  }
  0x89   :  { %1103 = vmatprep.subr.bf16.mxu0 %v3104_v2  ;;  %1185 = vmatprep.subr.bf16.mxu1 %v3107_v3  ;;  %v110_v2 = vrot.slane %v3716_v15, %v3728_v57  ;;  %v3132_v15 = vld [vmem:[#allocation4 + $0x260] ss:$16 sps:$4 sm:$0xff]  }
  0x8c   :  { %1104 = vmatpush1.bf16.msra.mxu0 %v3102_v4  ;;  %1186 = vmatpush1.bf16.msra.mxu1 %v3105_v5  ;;  %v3120_v4 = vld [vmem:[#allocation4 + $0x220] ss:$16 sps:$4 sm:$0xff]   ;;  %v3123_v5 = vld [vmem:[#allocation4 + $0x228] ss:$16 sps:$4 sm:$0xff]  }
  0x8d   :  { %1105 = vmatprep.subr.bf16.mxu0 %v3110_v6  ;;  %1187 = vmatprep.subr.bf16.mxu1 %v3113_v7  ;;  %v3128_v6 = vld [vmem:[#allocation4 + $0x244] ss:$16 sps:$4 sm:$0xff]   ;;  %v3131_v7 = vld [vmem:[#allocation4 + $0x24c] ss:$16 sps:$4 sm:$0xff]  }
  0x90   :  { %1106 = vmatpush1.bf16.msra.mxu0 %v3108_v8  ;;  %1188 = vmatpush1.bf16.msra.mxu1 %v3111_v9  ;;  %v3126_v9 = vld [vmem:[#allocation4 + $0x240] ss:$16 sps:$4 sm:$0xff]  }
  0x91   :  { %1116 = vmatprep.subr.bf16.mxu0 %v3116_v10  ;;  %1198 = vmatprep.subr.bf16.mxu1 %v3119_v11  ;;  %v3129_v10 = vld [vmem:[#allocation4 + $0x248] ss:$16 sps:$4 sm:$0xff]   ;;  %v3134_v11 = vld [vmem:[#allocation4 + $0x264] ss:$16 sps:$4 sm:$0xff]  }
 0x126   :  { %v197_v20 = vpop.f32.mrb[0].mxu0  ;;  %v238_v28 = vpop.f32.mrb[0].mxu1 }
 0x127   :  { %v198_v21 = vadd.f32 %v197_v20, %v102_v17  ;;  %v199_v22 = vpop.f32.mrb[1].mxu0  ;;  %v240_v30 = vpop.f32.mrb[1].mxu1  ;;  %v3744_v8 = vadd.f32 %v238_v28, %v110_v2  ;;  %v3135_v17 = vld [vmem:[#allocation4 + $0x268] ss:$16 sps:$4 sm:$0xff]   ;;  %v3143_v20 = vld [vmem:[#allocation4 + $0x28c] ss:$16 sps:$4 sm:$0xff]  }
 0x128   :  { %v200_v24 = vadd.f32 %v199_v22, %v106_v19  ;;  %v201_v25 = vpop.f32.mrb[2].mxu0  ;;  %v241_v32 = vadd.f32 %v240_v30, %v114_v23  ;;  %v242_v33 = vpop.f32.mrb[2].mxu1  ;;  %v3140_v19 = vld [vmem:[#allocation4 + $0x284] ss:$16 sps:$4 sm:$0xff]   ;;  %v3138_v22 = vld [vmem:[#allocation4 + $0x280] ss:$16 sps:$4 sm:$0xff]  }
 0x129   :  { %v245_v26 = vmin.f32 %v198_v21, 20.0  ;;  %v202_v27 = vpop.f32.mrb[3].mxu0  ;;  %v243_v35 = vpop.f32.mrb[3].mxu1  ;;  %v247_v13 = vmin.f32 %v3744_v8, 20.0  ;;  %v3141_v23 = vld [vmem:[#allocation4 + $0x288] ss:$16 sps:$4 sm:$0xff]  }
 0x12a   :  { %v246_v29 = vmin.f32 %v200_v24, 20.0  ;;  %v248_v36 = vmin.f32 %v241_v32, 20.0  ;;  %v3149_v25 = vld [vmem:[#allocation4 + $0x2ac] ss:$16 sps:$4 sm:$0xff]   ;;  %v3147_v27 = vld [vmem:[#allocation4 + $0x2a8] ss:$16 sps:$4 sm:$0xff]  }
 0x12b   :  { %v249_v31 = vmul.f32 1.442695, %v245_v26  ;;  %v3144_v26 = vld [vmem:[#allocation4 + $0x2a0] ss:$16 sps:$4 sm:$0xff]   ;;  %v3152_v28 = vld [vmem:[#allocation4 + $0x2c4] ss:$16 sps:$4 sm:$0xff]  }
 0x12c   :  { %v251_v34 = vmul.f32 1.442695, %v246_v29  ;;  %v255_v37 = vmul.f32 1.442695, %v248_v36  ;;  %v3155_v29 = vld [vmem:[#allocation4 + $0x2cc] ss:$16 sps:$4 sm:$0xff]  }
 0x12d   :  { %3434 = vpow2.f32 %v249_v31  ;;  %v3150_v30 = vld [vmem:[#allocation4 + $0x2c0] ss:$16 sps:$4 sm:$0xff]   ;;  %v3153_v31 = vld [vmem:[#allocation4 + $0x2c8] ss:$16 sps:$4 sm:$0xff]   ;;  %v3161_v33 = vld [vmem:[#allocation4 + $0x2ec] ss:$16 sps:$4 sm:$0xff]  }
 0x12e   :  { %3436 = vpow2.f32 %v251_v34  ;;  %v3156_v34 = vld [vmem:[#allocation4 + $0x2e0] ss:$16 sps:$4 sm:$0xff]   ;;  %v3159_v35 = vld [vmem:[#allocation4 + $0x2e8] ss:$16 sps:$4 sm:$0xff]  }
 0x12f   :  { %3438 = vpow2.f32 %v255_v37  ;;  %v3164_v37 = vld [vmem:[#allocation4 + $0x304] ss:$16 sps:$4 sm:$0xff]   ;;  %v3195_v2 = vld [vmem:[#allocation4 + $0x3a8] ss:$16 sps:$4 sm:$0xff]  }
 0x137   :  { %v3435_v38 = vpop.eup %3434 }
 0x138   :  { %v3437_v39 = vpop.eup %3436  ;;  %v257_v40 = vadd.f32 2.0, %v3435_v38 }
 0x139   :  { %v258_v41 = vadd.f32 2.0, %v3437_v39  ;;  %v3439_v43 = vpop.eup %3438 }
 0x13a   :  { %v261_v42 = vmul.f32 %v3435_v38, %v257_v40  ;;  %v260_v46 = vadd.f32 2.0, %v3439_v43  ;;  %v3167_v38 = vld [vmem:[#allocation4 + $0x30c] ss:$16 sps:$4 sm:$0xff]   ;;  %v3162_v40 = vld [vmem:[#allocation4 + $0x300] ss:$16 sps:$4 sm:$0xff]  }
 0x13b   :  { %v262_v44 = vmul.f32 %v3437_v39, %v258_v41  ;;  %v3165_v41 = vld [vmem:[#allocation4 + $0x308] ss:$16 sps:$4 sm:$0xff]  }
 0x13c   :  { %v265_v45 = vadd.f32 2.0, %v261_v42  ;;  %v264_v48 = vmul.f32 %v3439_v43, %v260_v46  ;;  %v3173_v43 = vld [vmem:[#allocation4 + $0x32c] ss:$16 sps:$4 sm:$0xff]   ;;  %v3171_v46 = vld [vmem:[#allocation4 + $0x328] ss:$16 sps:$4 sm:$0xff]  }
 0x13d   :  { %v266_v47 = vadd.f32 2.0, %v262_v44 }
 0x13e   :  { %3440 = vrcp.f32 %v265_v45  ;;  %v268_v49 = vadd.f32 2.0, %v264_v48  ;;  %v3168_v45 = vld [vmem:[#allocation4 + $0x320] ss:$16 sps:$4 sm:$0xff]  }
 0x13f   :  { %3442 = vrcp.f32 %v266_v47  ;;  %v3176_v47 = vld [vmem:[#allocation4 + $0x344] ss:$16 sps:$4 sm:$0xff]  }
 0x140   :  { %3444 = vrcp.f32 %v268_v49 }
 0x148   :  { %v3441_v50 = vpop.eup %3440 }
 0x149   :  { %v3443_v51 = vpop.eup %3442  ;;  %v273_v52 = vmul.f32 %v3441_v50, %v261_v42  ;;  %v3170_v42 = vld [vmem:[#allocation4 + $0x324] ss:$16 sps:$4 sm:$0xff]   ;;  %v3174_v50 = vld [vmem:[#allocation4 + $0x340] ss:$16 sps:$4 sm:$0xff]  }
 0x14a   :  { %v274_v53 = vmul.f32 %v3443_v51, %v262_v44  ;;  %v3445_v55 = vpop.eup %3444  ;;  %v3177_v51 = vld [vmem:[#allocation4 + $0x348] ss:$16 sps:$4 sm:$0xff]  }
 0x14b   :  { %v277_v54 = vmul.f32 %v273_v52, %v198_v21  ;;  %v276_v58 = vmul.f32 %v3445_v55, %v264_v48  ;;  %v253_v21 = vmul.f32 1.442695, %v247_v13  ;;  %v3179_v48 = vld [vmem:[#allocation4 + $0x34c] ss:$16 sps:$4 sm:$0xff]   ;;  %v3182_v52 = vld [vmem:[#allocation4 + $0x364] ss:$16 sps:$4 sm:$0xff]  }
 0x14c   :  { %v278_v56 = vmul.f32 %v274_v53, %v200_v24  ;;  %v3146_v24 = vld [vmem:[#allocation4 + $0x2a4] ss:$16 sps:$4 sm:$0xff]   ;;  %v3185_v53 = vld [vmem:[#allocation4 + $0x36c] ss:$16 sps:$4 sm:$0xff]   ;;  %v3183_v55 = vld [vmem:[#allocation4 + $0x368] ss:$16 sps:$4 sm:$0xff]  }
 0x14d   :  { %v3732_v62 = vpack.c.bf16 %v277_v54, %v277_v54  ;;  %v280_v63 = vmul.f32 %v276_v58, %v241_v32  ;;  %3446 = vpow2.f32 %v253_v21  ;;  %v3158_v32 = vld [vmem:[#allocation4 + $0x2e4] ss:$16 sps:$4 sm:$0xff]   ;;  %v3180_v54 = vld [vmem:[#allocation4 + $0x360] ss:$16 sps:$4 sm:$0xff]   ;;  %v3191_v58 = vld [vmem:[#allocation4 + $0x38c] ss:$16 sps:$4 sm:$0xff]  }
 0x14e   :  { %v3730_v59 = vpack.c.bf16 %v278_v56, %v278_v56  ;;  %v3188_v56 = vld [vmem:[#allocation4 + $0x384] ss:$16 sps:$4 sm:$0xff]   ;;  %v3204_v13 = vld [vmem:[#allocation4 + $0x3e0] ss:$16 sps:$4 sm:$0xff]  }
 0x14f   :  { %v3738_v3 = vpack.c.bf16 %v280_v63, %v280_v63  ;;  %v3194_v63 = vld [vmem:[#allocation4 + $0x3a4] ss:$16 sps:$4 sm:$0xff]   ;;  %v3210_v21 = vld [vmem:[#allocation6] ss:$16 sps:$4 sm:$0xff]  }
 0x150   :  { %1107 = vmatprep.mubr.bf16.mxu0 %v3730_v59  ;;  %1189 = vmatprep.mubr.bf16.mxu1 %v3730_v59 }
 0x151   :  { %1108 = vmatmul.mubr.bf16.vlgmr.msra.gmra.mrb[4].mxu0 %v3732_v62  ;;  %1190 = vmatmul.mubr.bf16.vlgmr.msra.gmra.mrb[4].mxu1 %v3732_v62 }
 0x152   :  { %1117 = vmatpush1.bf16.msra.mxu0 %v3114_v60  ;;  %1199 = vmatpush1.bf16.msra.mxu1 %v3117_v61  ;;  %v3186_v60 = vld [vmem:[#allocation4 + $0x380] ss:$16 sps:$4 sm:$0xff]   ;;  %v3189_v61 = vld [vmem:[#allocation4 + $0x388] ss:$16 sps:$4 sm:$0xff]  }
 0x153   :  { %1118 = vmatprep.subr.bf16.mxu0 %v3122_v0  ;;  %1200 = vmatprep.subr.bf16.mxu1 %v3125_v1  ;;  %v3197_v0 = vld [vmem:[#allocation4 + $0x3ac] ss:$16 sps:$4 sm:$0xff]   ;;  %v3192_v1 = vld [vmem:[#allocation4 + $0x3a0] ss:$16 sps:$4 sm:$0xff]  }
 0x154   :  { %1148 = vmatprep.mubr.bf16.mxu0 %v3738_v3  ;;  %1230 = vmatprep.mubr.bf16.mxu1 %v3738_v3 }
 0x156   :  { %1119 = vmatpush1.bf16.msra.mxu0 %v3120_v4  ;;  %1201 = vmatpush1.bf16.msra.mxu1 %v3123_v5  ;;  %v3200_v4 = vld [vmem:[#allocation4 + $0x3c4] ss:$16 sps:$4 sm:$0xff]   ;;  %v3203_v5 = vld [vmem:[#allocation4 + $0x3cc] ss:$16 sps:$4 sm:$0xff]  }
 0x157   :  { %1120 = vmatprep.subr.bf16.mxu0 %v3128_v6  ;;  %1202 = vmatprep.subr.bf16.mxu1 %v3131_v7  ;;  %v3447_v36 = vpop.eup %3446  ;;  %v3198_v7 = vld [vmem:[#allocation4 + $0x3c0] ss:$16 sps:$4 sm:$0xff]  }
 0x158   :  { %v259_v39 = vadd.f32 2.0, %v3447_v36 }
 0x15a   :  { %1121 = vmatpush1.bf16.msra.mxu0 %v3126_v9  ;;  %1203 = vmatpush1.bf16.msra.mxu1 %v3129_v10  ;;  %v263_v44 = vmul.f32 %v3447_v36, %v259_v39  ;;  %v3201_v9 = vld [vmem:[#allocation4 + $0x3c8] ss:$16 sps:$4 sm:$0xff]   ;;  %v3239_v36 = vld [vmem:[#allocation6 + $0x8c] ss:$16 sps:$4 sm:$0xff]   ;;  %v3242_v39 = vld [vmem:[#allocation6 + $0xa4] ss:$16 sps:$4 sm:$0xff]  }
 0x15b   :  { %1122 = vmatprep.subr.bf16.mxu0 %v3134_v11  ;;  %1204 = vmatprep.subr.bf16.mxu1 %v3137_v12  ;;  %v3206_v11 = vld [vmem:[#allocation4 + $0x3e4] ss:$16 sps:$4 sm:$0xff]   ;;  %v3209_v12 = vld [vmem:[#allocation4 + $0x3ec] ss:$16 sps:$4 sm:$0xff]  }
 0x15c   :  { %v267_v49 = vadd.f32 2.0, %v263_v44 }
 0x15e   :  { %1123 = vmatpush1.bf16.msra.mxu0 %v3132_v15  ;;  %1205 = vmatpush1.bf16.msra.mxu1 %v3135_v17  ;;  %3448 = vrcp.f32 %v267_v49  ;;  %v3207_v15 = vld [vmem:[#allocation4 + $0x3e8] ss:$16 sps:$4 sm:$0xff]   ;;  %v3252_v49 = vld [vmem:[#allocation6 + $0xe0] ss:$16 sps:$4 sm:$0xff]  }
 0x15f   :  { %1124 = vmatprep.subr.bf16.mxu0 %v3140_v19  ;;  %1206 = vmatprep.subr.bf16.mxu1 %v3143_v20  ;;  %v3212_v19 = vld [vmem:[#allocation6 + $0x4] ss:$16 sps:$4 sm:$0xff]   ;;  %v3215_v20 = vld [vmem:[#allocation6 + $0xc] ss:$16 sps:$4 sm:$0xff]  }
 0x162   :  { %1125 = vmatpush1.bf16.msra.mxu0 %v3138_v22  ;;  %1207 = vmatpush1.bf16.msra.mxu1 %v3141_v23  ;;  %v3213_v22 = vld [vmem:[#allocation6 + $0x8] ss:$16 sps:$4 sm:$0xff]  }
 0x163   :  { %1126 = vmatprep.subr.bf16.mxu0 %v3146_v24  ;;  %1208 = vmatprep.subr.bf16.mxu1 %v3149_v25  ;;  %v3218_v24 = vld [vmem:[#allocation6 + $0x24] ss:$16 sps:$4 sm:$0xff]   ;;  %v3221_v25 = vld [vmem:[#allocation6 + $0x2c] ss:$16 sps:$4 sm:$0xff]  }
 0x166   :  { %1127 = vmatpush1.bf16.msra.mxu0 %v3144_v26  ;;  %1209 = vmatpush1.bf16.msra.mxu1 %v3147_v27  ;;  %v3219_v26 = vld [vmem:[#allocation6 + $0x28] ss:$16 sps:$4 sm:$0xff]   ;;  %v3224_v27 = vld [vmem:[#allocation6 + $0x44] ss:$16 sps:$4 sm:$0xff]  }
 0x167   :  { %1128 = vmatprep.subr.bf16.mxu0 %v3152_v28  ;;  %1210 = vmatprep.subr.bf16.mxu1 %v3155_v29  ;;  %v3227_v28 = vld [vmem:[#allocation6 + $0x4c] ss:$16 sps:$4 sm:$0xff]   ;;  %v3222_v29 = vld [vmem:[#allocation6 + $0x40] ss:$16 sps:$4 sm:$0xff]  }
 0x168   :  { %v3449_v6 = vpop.eup %3448 }
 0x169   :  { %v275_v10 = vmul.f32 %v3449_v6, %v263_v44  ;;  %v3251_v44 = vld [vmem:[#allocation6 + $0xcc] ss:$16 sps:$4 sm:$0xff]   ;;  %v3279_v6 = vld [vmem:[#allocation6 + $0x168] ss:$16 sps:$4 sm:$0xff]  }
 0x16a   :  { %1129 = vmatpush1.bf16.msra.mxu0 %v3150_v30  ;;  %1211 = vmatpush1.bf16.msra.mxu1 %v3153_v31  ;;  %v3225_v30 = vld [vmem:[#allocation6 + $0x48] ss:$16 sps:$4 sm:$0xff]   ;;  %v3230_v31 = vld [vmem:[#allocation6 + $0x64] ss:$16 sps:$4 sm:$0xff]  }
 0x16b   :  { %1130 = vmatprep.subr.bf16.mxu0 %v3158_v32  ;;  %1212 = vmatprep.subr.bf16.mxu1 %v3161_v33  ;;  %v279_v17 = vmul.f32 %v275_v10, %v3744_v8  ;;  %v3216_v8 = vld [vmem:[#allocation6 + $0x20] ss:$16 sps:$4 sm:$0xff]   ;;  %v3233_v32 = vld [vmem:[#allocation6 + $0x6c] ss:$16 sps:$4 sm:$0xff]  }
 0x16c   :  { %v3228_v33 = vld [vmem:[#allocation6 + $0x60] ss:$16 sps:$4 sm:$0xff]  }
 0x16d   :  { %v3748_v23 = vpack.c.bf16 %v279_v17, %v279_v17  ;;  %v3282_v10 = vld [vmem:[#allocation6 + $0x180] ss:$16 sps:$4 sm:$0xff]   ;;  %v3291_v17 = vld [vmem:[#allocation6 + $0x1a8] ss:$16 sps:$4 sm:$0xff]  }
 0x16e   :  { %1131 = vmatpush1.bf16.msra.mxu0 %v3156_v34  ;;  %1213 = vmatpush1.bf16.msra.mxu1 %v3159_v35  ;;  %v3231_v34 = vld [vmem:[#allocation6 + $0x68] ss:$16 sps:$4 sm:$0xff]   ;;  %v3236_v35 = vld [vmem:[#allocation6 + $0x84] ss:$16 sps:$4 sm:$0xff]  }
 0x16f   :  { %1132 = vmatprep.subr.bf16.mxu0 %v3164_v37  ;;  %1214 = vmatprep.subr.bf16.mxu1 %v3167_v38  ;;  %v3234_v37 = vld [vmem:[#allocation6 + $0x80] ss:$16 sps:$4 sm:$0xff]   ;;  %v3237_v38 = vld [vmem:[#allocation6 + $0x88] ss:$16 sps:$4 sm:$0xff]  }
 0x172   :  { %1133 = vmatpush1.bf16.msra.mxu0 %v3162_v40  ;;  %1215 = vmatpush1.bf16.msra.mxu1 %v3165_v41  ;;  %v3245_v40 = vld [vmem:[#allocation6 + $0xac] ss:$16 sps:$4 sm:$0xff]   ;;  %v3240_v41 = vld [vmem:[#allocation6 + $0xa0] ss:$16 sps:$4 sm:$0xff]  }
 0x173   :  { %1134 = vmatprep.subr.bf16.mxu0 %v3170_v42  ;;  %1216 = vmatprep.subr.bf16.mxu1 %v3173_v43  ;;  %v3243_v42 = vld [vmem:[#allocation6 + $0xa8] ss:$16 sps:$4 sm:$0xff]   ;;  %v3248_v43 = vld [vmem:[#allocation6 + $0xc4] ss:$16 sps:$4 sm:$0xff]  }
 0x176   :  { %1135 = vmatpush1.bf16.msra.mxu0 %v3168_v45  ;;  %1217 = vmatpush1.bf16.msra.mxu1 %v3171_v46  ;;  %v3246_v45 = vld [vmem:[#allocation6 + $0xc0] ss:$16 sps:$4 sm:$0xff]   ;;  %v3249_v46 = vld [vmem:[#allocation6 + $0xc8] ss:$16 sps:$4 sm:$0xff]  }
 0x177   :  { %1136 = vmatprep.subr.bf16.mxu0 %v3176_v47  ;;  %1218 = vmatprep.subr.bf16.mxu1 %v3179_v48  ;;  %v3254_v47 = vld [vmem:[#allocation6 + $0xe4] ss:$16 sps:$4 sm:$0xff]   ;;  %v3257_v48 = vld [vmem:[#allocation6 + $0xec] ss:$16 sps:$4 sm:$0xff]  }
 0x17a   :  { %1137 = vmatpush1.bf16.msra.mxu0 %v3174_v50  ;;  %1219 = vmatpush1.bf16.msra.mxu1 %v3177_v51  ;;  %v3255_v50 = vld [vmem:[#allocation6 + $0xe8] ss:$16 sps:$4 sm:$0xff]   ;;  %v3260_v51 = vld [vmem:[#allocation6 + $0x104] ss:$16 sps:$4 sm:$0xff]  }
 0x17b   :  { %1138 = vmatprep.subr.bf16.mxu0 %v3182_v52  ;;  %1220 = vmatprep.subr.bf16.mxu1 %v3185_v53  ;;  %v3263_v52 = vld [vmem:[#allocation6 + $0x10c] ss:$16 sps:$4 sm:$0xff]   ;;  %v3258_v53 = vld [vmem:[#allocation6 + $0x100] ss:$16 sps:$4 sm:$0xff]  }
 0x17e   :  { %1139 = vmatpush1.bf16.msra.mxu0 %v3180_v54  ;;  %1221 = vmatpush1.bf16.msra.mxu1 %v3183_v55  ;;  %v3261_v54 = vld [vmem:[#allocation6 + $0x108] ss:$16 sps:$4 sm:$0xff]   ;;  %v3266_v55 = vld [vmem:[#allocation6 + $0x124] ss:$16 sps:$4 sm:$0xff]  }
 0x17f   :  { %1140 = vmatprep.subr.bf16.mxu0 %v3188_v56  ;;  %1222 = vmatprep.subr.bf16.mxu1 %v3191_v58  ;;  %v3269_v56 = vld [vmem:[#allocation6 + $0x12c] ss:$16 sps:$4 sm:$0xff]   ;;  %v3264_v58 = vld [vmem:[#allocation6 + $0x120] ss:$16 sps:$4 sm:$0xff]  }
 0x182   :  { %1141 = vmatpush1.bf16.msra.mxu0 %v3186_v60  ;;  %1223 = vmatpush1.bf16.msra.mxu1 %v3189_v61  ;;  %v3267_v60 = vld [vmem:[#allocation6 + $0x128] ss:$16 sps:$4 sm:$0xff]   ;;  %v3272_v61 = vld [vmem:[#allocation6 + $0x144] ss:$16 sps:$4 sm:$0xff]  }
 0x183   :  { %1142 = vmatprep.subr.bf16.mxu0 %v3194_v63  ;;  %1224 = vmatprep.subr.bf16.mxu1 %v3197_v0  ;;  %v3275_v63 = vld [vmem:[#allocation6 + $0x14c] ss:$16 sps:$4 sm:$0xff]   ;;  %v3270_v0 = vld [vmem:[#allocation6 + $0x140] ss:$16 sps:$4 sm:$0xff]  }
 0x186   :  { %1143 = vmatpush1.bf16.msra.mxu0 %v3192_v1  ;;  %1225 = vmatpush1.bf16.msra.mxu1 %v3195_v2  ;;  %v3273_v1 = vld [vmem:[#allocation6 + $0x148] ss:$16 sps:$4 sm:$0xff]   ;;  %v3278_v2 = vld [vmem:[#allocation6 + $0x164] ss:$16 sps:$4 sm:$0xff]  }
 0x187   :  { %1144 = vmatprep.subr.bf16.mxu0 %v3200_v4  ;;  %1226 = vmatprep.subr.bf16.mxu1 %v3203_v5  ;;  %v3281_v4 = vld [vmem:[#allocation6 + $0x16c] ss:$16 sps:$4 sm:$0xff]   ;;  %v3276_v5 = vld [vmem:[#allocation6 + $0x160] ss:$16 sps:$4 sm:$0xff]  }
 0x18a   :  { %1145 = vmatpush1.bf16.msra.mxu0 %v3198_v7  ;;  %1227 = vmatpush1.bf16.msra.mxu1 %v3201_v9  ;;  %v3284_v7 = vld [vmem:[#allocation6 + $0x184] ss:$16 sps:$4 sm:$0xff]   ;;  %v3287_v9 = vld [vmem:[#allocation6 + $0x18c] ss:$16 sps:$4 sm:$0xff]  }
 0x18b   :  { %1146 = vmatprep.subr.bf16.mxu0 %v3206_v11  ;;  %1228 = vmatprep.subr.bf16.mxu1 %v3209_v12  ;;  %v3285_v11 = vld [vmem:[#allocation6 + $0x188] ss:$16 sps:$4 sm:$0xff]   ;;  %v3290_v12 = vld [vmem:[#allocation6 + $0x1a4] ss:$16 sps:$4 sm:$0xff]  }
 0x18e   :  { %1147 = vmatpush1.bf16.msra.mxu0 %v3204_v13  ;;  %1229 = vmatpush1.bf16.msra.mxu1 %v3207_v15  ;;  %v3293_v13 = vld [vmem:[#allocation6 + $0x1ac] ss:$16 sps:$4 sm:$0xff]   ;;  %v3288_v15 = vld [vmem:[#allocation6 + $0x1a0] ss:$16 sps:$4 sm:$0xff]  }
 0x18f   :  { %2069 = vmatprep.subr.bf16.mxu0 %v3212_v19  ;;  %2151 = vmatprep.subr.bf16.mxu1 %v3215_v20  ;;  %v3296_v19 = vld [vmem:[#allocation6 + $0x1c4] ss:$16 sps:$4 sm:$0xff]   ;;  %v3299_v20 = vld [vmem:[#allocation6 + $0x1cc] ss:$16 sps:$4 sm:$0xff]  }
 0x191   :  { %1149 = vmatmul.mubr.bf16.vlgmr.msra.gmra.mrb[4].mxu0 %v3748_v23  ;;  %1231 = vmatmul.mubr.bf16.vlgmr.msra.gmra.mrb[4].mxu1 %v3748_v23 }
 0x192   :  { %2070 = vmatpush1.bf16.msra.mxu0 %v3210_v21  ;;  %2152 = vmatpush1.bf16.msra.mxu1 %v3213_v22  ;;  %v3294_v21 = vld [vmem:[#allocation6 + $0x1c0] ss:$16 sps:$4 sm:$0xff]   ;;  %v3297_v22 = vld [vmem:[#allocation6 + $0x1c8] ss:$16 sps:$4 sm:$0xff]  }
 0x193   :  { %2071 = vmatprep.subr.bf16.mxu0 %v3218_v24  ;;  %2153 = vmatprep.subr.bf16.mxu1 %v3221_v25  ;;  %v3302_v24 = vld [vmem:[#allocation6 + $0x1e4] ss:$16 sps:$4 sm:$0xff]   ;;  %v3305_v25 = vld [vmem:[#allocation6 + $0x1ec] ss:$16 sps:$4 sm:$0xff]  }
 0x196   :  { %2072 = vmatpush1.bf16.msra.mxu0 %v3216_v8  ;;  %2154 = vmatpush1.bf16.msra.mxu1 %v3219_v26  ;;  %v3300_v8 = vld [vmem:[#allocation6 + $0x1e0] ss:$16 sps:$4 sm:$0xff]   ;;  %v3303_v26 = vld [vmem:[#allocation6 + $0x1e8] ss:$16 sps:$4 sm:$0xff]  }
 0x197   :  { %2073 = vmatprep.subr.bf16.mxu0 %v3224_v27  ;;  %2155 = vmatprep.subr.bf16.mxu1 %v3227_v28  ;;  %v3308_v27 = vld [vmem:[#allocation6 + $0x204] ss:$16 sps:$4 sm:$0xff]   ;;  %v3311_v28 = vld [vmem:[#allocation6 + $0x20c] ss:$16 sps:$4 sm:$0xff]  }
 0x19a   :  { %2074 = vmatpush1.bf16.msra.mxu0 %v3222_v29  ;;  %2156 = vmatpush1.bf16.msra.mxu1 %v3225_v30  ;;  %v3755_v29 = vld [vmem:[%s3793_s4] sm:$0xf] }
 0x19b   :  { %2075 = vmatprep.subr.bf16.mxu0 %v3230_v31  ;;  %2157 = vmatprep.subr.bf16.mxu1 %v3233_v32  ;;  %v418_v30 = vrot.slane %v3755_v29, %v3711_v14  ;;  %v422_v31 = vrot.slane %v3755_v29, %v3718_v16  ;;  %v430_v32 = vrot.slane %v3755_v29, %v3722_v18 }
 0x19e   :  { %2076 = vmatpush1.bf16.msra.mxu0 %v3228_v33  ;;  %2158 = vmatpush1.bf16.msra.mxu1 %v3231_v34 }
 0x19f   :  { %2077 = vmatprep.subr.bf16.mxu0 %v3236_v35  ;;  %2159 = vmatprep.subr.bf16.mxu1 %v3239_v36 }
 0x1a2   :  { %2078 = vmatpush1.bf16.msra.mxu0 %v3234_v37  ;;  %2160 = vmatpush1.bf16.msra.mxu1 %v3237_v38 }
 0x1a3   :  { %2079 = vmatprep.subr.bf16.mxu0 %v3242_v39  ;;  %2161 = vmatprep.subr.bf16.mxu1 %v3245_v40 }
 0x1a6   :  { %2080 = vmatpush1.bf16.msra.mxu0 %v3240_v41  ;;  %2162 = vmatpush1.bf16.msra.mxu1 %v3243_v42 }
 0x1a7   :  { %2081 = vmatprep.subr.bf16.mxu0 %v3248_v43  ;;  %2163 = vmatprep.subr.bf16.mxu1 %v3251_v44 }
 0x1aa   :  { %2082 = vmatpush1.bf16.msra.mxu0 %v3246_v45  ;;  %2164 = vmatpush1.bf16.msra.mxu1 %v3249_v46 }
 0x1ab   :  { %2083 = vmatprep.subr.bf16.mxu0 %v3254_v47  ;;  %2165 = vmatprep.subr.bf16.mxu1 %v3257_v48 }
 0x1ae   :  { %2084 = vmatpush1.bf16.msra.mxu0 %v3252_v49  ;;  %2166 = vmatpush1.bf16.msra.mxu1 %v3255_v50 }
 0x1af   :  { %2085 = vmatprep.subr.bf16.mxu0 %v3260_v51  ;;  %2167 = vmatprep.subr.bf16.mxu1 %v3263_v52 }
 0x1b2   :  { %2086 = vmatpush1.bf16.msra.mxu0 %v3258_v53  ;;  %2168 = vmatpush1.bf16.msra.mxu1 %v3261_v54 }
 0x1b3   :  { %2087 = vmatprep.subr.bf16.mxu0 %v3266_v55  ;;  %2169 = vmatprep.subr.bf16.mxu1 %v3269_v56 }
 0x1b6   :  { %2088 = vmatpush1.bf16.msra.mxu0 %v3264_v58  ;;  %2170 = vmatpush1.bf16.msra.mxu1 %v3267_v60 }
 0x1b7   :  { %2089 = vmatprep.subr.bf16.mxu0 %v3272_v61  ;;  %2171 = vmatprep.subr.bf16.mxu1 %v3275_v63 }
 0x1ba   :  { %2090 = vmatpush1.bf16.msra.mxu0 %v3270_v0  ;;  %2172 = vmatpush1.bf16.msra.mxu1 %v3273_v1 }
 0x1bb   :  { %2091 = vmatprep.subr.bf16.mxu0 %v3278_v2  ;;  %2173 = vmatprep.subr.bf16.mxu1 %v3281_v4 }
 0x1be   :  { %2092 = vmatpush1.bf16.msra.mxu0 %v3276_v5  ;;  %2174 = vmatpush1.bf16.msra.mxu1 %v3279_v6 }
 0x1bf   :  { %2093 = vmatprep.subr.bf16.mxu0 %v3284_v7  ;;  %2175 = vmatprep.subr.bf16.mxu1 %v3287_v9 }
 0x1c2   :  { %2094 = vmatpush1.bf16.msra.mxu0 %v3282_v10  ;;  %2176 = vmatpush1.bf16.msra.mxu1 %v3285_v11 }
 0x1c3   :  { %2095 = vmatprep.subr.bf16.mxu0 %v3290_v12  ;;  %2177 = vmatprep.subr.bf16.mxu1 %v3293_v13  ;;  %v3306_v13 = vld [vmem:[#allocation6 + $0x200] ss:$16 sps:$4 sm:$0xff]  }
 0x1c6   :  { %2096 = vmatpush1.bf16.msra.mxu0 %v3288_v15  ;;  %2178 = vmatpush1.bf16.msra.mxu1 %v3291_v17  ;;  %v3309_v15 = vld [vmem:[#allocation6 + $0x208] ss:$16 sps:$4 sm:$0xff]  }
 0x1c7   :  { %2097 = vmatprep.subr.bf16.mxu0 %v3296_v19  ;;  %2179 = vmatprep.subr.bf16.mxu1 %v3299_v20  ;;  %v3314_v19 = vld [vmem:[#allocation6 + $0x224] ss:$16 sps:$4 sm:$0xff]   ;;  %v3317_v20 = vld [vmem:[#allocation6 + $0x22c] ss:$16 sps:$4 sm:$0xff]  }
 0x1ca   :  { %2098 = vmatpush1.bf16.msra.mxu0 %v3294_v21  ;;  %2180 = vmatpush1.bf16.msra.mxu1 %v3297_v22  ;;  %v426_v21 = vrot.slane %v3755_v29, %v3728_v57  ;;  %v3321_v29 = vld [vmem:[#allocation6 + $0x248] ss:$16 sps:$4 sm:$0xff]  }
 0x1cb   :  { %2099 = vmatprep.subr.bf16.mxu0 %v3302_v24  ;;  %2181 = vmatprep.subr.bf16.mxu1 %v3305_v25  ;;  %v3312_v24 = vld [vmem:[#allocation6 + $0x220] ss:$16 sps:$4 sm:$0xff]   ;;  %v3315_v25 = vld [vmem:[#allocation6 + $0x228] ss:$16 sps:$4 sm:$0xff]  }
 0x1ce   :  { %2100 = vmatpush1.bf16.msra.mxu0 %v3300_v8  ;;  %2182 = vmatpush1.bf16.msra.mxu1 %v3303_v26  ;;  %v3320_v8 = vld [vmem:[#allocation6 + $0x244] ss:$16 sps:$4 sm:$0xff]   ;;  %v3323_v26 = vld [vmem:[#allocation6 + $0x24c] ss:$16 sps:$4 sm:$0xff]  }
 0x1cf   :  { %2110 = vmatprep.subr.bf16.mxu0 %v3308_v27  ;;  %2192 = vmatprep.subr.bf16.mxu1 %v3311_v28  ;;  %v3318_v28 = vld [vmem:[#allocation6 + $0x240] ss:$16 sps:$4 sm:$0xff]  }
 0x264   :  { %v1150_v33 = vpop.f32.mrb[4].mxu0  ;;  %v3763_v34 = vpop.f32.mrb[4].mxu1 }
 0x265   :  { %v2973_v35 = vadd.f32 %v1150_v33, %v418_v30  ;;  %v1152_v36 = vpop.f32.mrb[5].mxu0  ;;  %v1234_v37 = vpop.f32.mrb[5].mxu1  ;;  %v3768_v27 = vadd.f32 %v3763_v34, %v426_v21  ;;  %v3326_v30 = vld [vmem:[#allocation6 + $0x264] ss:$16 sps:$4 sm:$0xff]   ;;  %v3324_v33 = vld [vmem:[#allocation6 + $0x260] ss:$16 sps:$4 sm:$0xff]  }
 0x266   :  { %v2974_v38 = vadd.f32 %v1152_v36, %v422_v31  ;;  %v2976_v39 = vadd.f32 %v1234_v37, %v430_v32  ;;  %v1154_v40 = vpop.f32.mrb[6].mxu0  ;;  %v1236_v41 = vpop.f32.mrb[6].mxu1  ;;  %v3329_v31 = vld [vmem:[#allocation6 + $0x26c] ss:$16 sps:$4 sm:$0xff]   ;;  %v3332_v36 = vld [vmem:[#allocation6 + $0x284] ss:$16 sps:$4 sm:$0xff]  }
 0x267   :  { %v1239_v42 = vmin.f32 %v2973_v35, 20.0  ;;  %v1155_v43 = vpop.f32.mrb[7].mxu0  ;;  %v1237_v44 = vpop.f32.mrb[7].mxu1  ;;  %v1241_v32 = vmin.f32 %v3768_v27, 20.0  ;;  %v3335_v37 = vld [vmem:[#allocation6 + $0x28c] ss:$16 sps:$4 sm:$0xff]  }
 0x268   :  { %v1240_v45 = vmin.f32 %v2974_v38, 20.0  ;;  %v1242_v46 = vmin.f32 %v2976_v39, 20.0  ;;  %v3338_v40 = vld [vmem:[#allocation6 + $0x2a4] ss:$16 sps:$4 sm:$0xff]   ;;  %v3341_v41 = vld [vmem:[#allocation6 + $0x2ac] ss:$16 sps:$4 sm:$0xff]  }
 0x269   :  { %v1243_v47 = vmul.f32 1.442695, %v1239_v42  ;;  %v1247_v34 = vmul.f32 1.442695, %v1241_v32  ;;  %v3336_v42 = vld [vmem:[#allocation6 + $0x2a0] ss:$16 sps:$4 sm:$0xff]  }
 0x26a   :  { %v1245_v48 = vmul.f32 1.442695, %v1240_v45  ;;  %v1249_v49 = vmul.f32 1.442695, %v1242_v46  ;;  %v3339_v43 = vld [vmem:[#allocation6 + $0x2a8] ss:$16 sps:$4 sm:$0xff]  }
 0x26b   :  { %3450 = vpow2.f32 %v1243_v47  ;;  %v3344_v44 = vld [vmem:[#allocation6 + $0x2c4] ss:$16 sps:$4 sm:$0xff]   ;;  %v3347_v45 = vld [vmem:[#allocation6 + $0x2cc] ss:$16 sps:$4 sm:$0xff]   ;;  %v3342_v46 = vld [vmem:[#allocation6 + $0x2c0] ss:$16 sps:$4 sm:$0xff]  }
 0x26c   :  { %3452 = vpow2.f32 %v1245_v48  ;;  %v3345_v47 = vld [vmem:[#allocation6 + $0x2c8] ss:$16 sps:$4 sm:$0xff]   ;;  %v3350_v48 = vld [vmem:[#allocation6 + $0x2e4] ss:$16 sps:$4 sm:$0xff]   ;;  %v3389_v21 = vld [vmem:[#allocation6 + $0x3ac] ss:$16 sps:$4 sm:$0xff]  }
 0x26d   :  { %3454 = vpow2.f32 %v1249_v49  ;;  %v3353_v49 = vld [vmem:[#allocation6 + $0x2ec] ss:$16 sps:$4 sm:$0xff]  }
 0x26e   :  { %v3401_v32 = vld [vmem:[#allocation6 + $0x3ec] ss:$16 sps:$4 sm:$0xff]  }
 0x275   :  { %v3451_v50 = vpop.eup %3450 }
 0x276   :  { %v1251_v51 = vadd.f32 2.0, %v3451_v50  ;;  %v3453_v52 = vpop.eup %3452 }
 0x277   :  { %v3455_v53 = vpop.eup %3454  ;;  %v1252_v55 = vadd.f32 2.0, %v3453_v52 }
 0x278   :  { %v1255_v54 = vmul.f32 %v3451_v50, %v1251_v51  ;;  %v1254_v56 = vadd.f32 2.0, %v3455_v53  ;;  %v3348_v50 = vld [vmem:[#allocation6 + $0x2e0] ss:$16 sps:$4 sm:$0xff]   ;;  %v3351_v51 = vld [vmem:[#allocation6 + $0x2e8] ss:$16 sps:$4 sm:$0xff]  }
 0x279   :  { %v1256_v60 = vmul.f32 %v3453_v52, %v1252_v55 }
 0x27a   :  { %v1259_v58 = vadd.f32 2.0, %v1255_v54  ;;  %v1258_v61 = vmul.f32 %v3455_v53, %v1254_v56  ;;  %v3356_v53 = vld [vmem:[#allocation6 + $0x304] ss:$16 sps:$4 sm:$0xff]   ;;  %v3354_v56 = vld [vmem:[#allocation6 + $0x300] ss:$16 sps:$4 sm:$0xff]  }
 0x27b   :  { %v1260_v63 = vadd.f32 2.0, %v1256_v60 }
 0x27c   :  { %3456 = vrcp.f32 %v1259_v58  ;;  %v1262_v0 = vadd.f32 2.0, %v1258_v61  ;;  %v3357_v58 = vld [vmem:[#allocation6 + $0x308] ss:$16 sps:$4 sm:$0xff]  }
 0x27d   :  { %3458 = vrcp.f32 %v1260_v63 }
 0x27e   :  { %3460 = vrcp.f32 %v1262_v0  ;;  %v3360_v0 = vld [vmem:[#allocation6 + $0x320] ss:$16 sps:$4 sm:$0xff]  }
 0x27f   :  { %3462 = vpow2.f32 %v1247_v34  ;;  %v3402_v34 = vld [vmem:[#allocation7 + $0x40] sm:$0xff]  }
 0x286   :  { %v3457_v1 = vpop.eup %3456 }
 0x287   :  { %v1267_v2 = vmul.f32 %v3457_v1, %v1255_v54  ;;  %v3459_v4 = vpop.eup %3458  ;;  %v3359_v54 = vld [vmem:[#allocation6 + $0x30c] ss:$16 sps:$4 sm:$0xff]   ;;  %v3363_v1 = vld [vmem:[#allocation6 + $0x328] ss:$16 sps:$4 sm:$0xff]  }
 0x288   :  { %v3461_v5 = vpop.eup %3460  ;;  %v1268_v6 = vmul.f32 %v3459_v4, %v1256_v60  ;;  %v3362_v60 = vld [vmem:[#allocation6 + $0x324] ss:$16 sps:$4 sm:$0xff]   ;;  %v3371_v4 = vld [vmem:[#allocation6 + $0x34c] ss:$16 sps:$4 sm:$0xff]  }
 0x289   :  { %v1271_v7 = vmul.f32 %v2973_v35, %v1267_v2  ;;  %v1270_v9 = vmul.f32 %v3461_v5, %v1258_v61  ;;  %v3327_v35 = vld [vmem:[#allocation6 + $0x268] ss:$16 sps:$4 sm:$0xff]   ;;  %v3463_v52 = vpop.eup %3462  ;;  %v3365_v61 = vld [vmem:[#allocation6 + $0x32c] ss:$16 sps:$4 sm:$0xff]   ;;  %v3368_v2 = vld [vmem:[#allocation6 + $0x344] ss:$16 sps:$4 sm:$0xff]  }
 0x28a   :  { %v1272_v10 = vmul.f32 %v2974_v38, %v1268_v6  ;;  %v3330_v38 = vld [vmem:[#allocation6 + $0x280] ss:$16 sps:$4 sm:$0xff]   ;;  %v1253_v55 = vadd.f32 2.0, %v3463_v52 }
 0x28b   :  { %v1274_v11 = vmul.f32 %v2976_v39, %v1270_v9  ;;  %v1275_v17 = vpack.c.bf16 %v1271_v7, %v1271_v7  ;;  %v3333_v39 = vld [vmem:[#allocation6 + $0x288] ss:$16 sps:$4 sm:$0xff]   ;;  %v3366_v6 = vld [vmem:[#allocation6 + $0x340] ss:$16 sps:$4 sm:$0xff]   ;;  %v3374_v9 = vld [vmem:[#allocation6 + $0x364] ss:$16 sps:$4 sm:$0xff]  }
 0x28c   :  { %v1276_v12 = vpack.c.bf16 %v1272_v10, %v1272_v10  ;;  %v1257_v63 = vmul.f32 %v3463_v52, %v1253_v55  ;;  %v3369_v7 = vld [vmem:[#allocation6 + $0x348] ss:$16 sps:$4 sm:$0xff]   ;;  %v3377_v10 = vld [vmem:[#allocation6 + $0x36c] ss:$16 sps:$4 sm:$0xff]   ;;  %v3418_v52 = vld [vmem:[#allocation7 + $0x60] sm:$0xff]  }
 0x28d   :  { %v1278_v22 = vpack.c.bf16 %v1274_v11, %v1274_v11  ;;  %v3372_v11 = vld [vmem:[#allocation6 + $0x360] ss:$16 sps:$4 sm:$0xff]  }
 0x28e   :  { %2101 = vmatprep.mubr.bf16.mxu0 %v1276_v12  ;;  %2183 = vmatprep.mubr.bf16.mxu1 %v1276_v12  ;;  %v1261_v5 = vadd.f32 2.0, %v1257_v63  ;;  %v3375_v12 = vld [vmem:[#allocation6 + $0x368] ss:$16 sps:$4 sm:$0xff]   ;;  %v3421_v55 = vld [vmem:[#allocation7 + $0xa0] sm:$0xff]  }
 0x28f   :  { %2102 = vmatmul.mubr.bf16.vlgmr.msra.gmra.mrb[8].mxu0 %v1275_v17  ;;  %2184 = vmatmul.mubr.bf16.vlgmr.msra.gmra.mrb[8].mxu1 %v1275_v17  ;;  %v3378_v17 = vld [vmem:[#allocation6 + $0x380] ss:$16 sps:$4 sm:$0xff]  }
 0x290   :  { %2111 = vmatpush1.bf16.msra.mxu0 %v3306_v13  ;;  %2193 = vmatpush1.bf16.msra.mxu1 %v3309_v15  ;;  %3464 = vrcp.f32 %v1261_v5  ;;  %v3380_v13 = vld [vmem:[#allocation6 + $0x384] ss:$16 sps:$4 sm:$0xff]   ;;  %v3383_v15 = vld [vmem:[#allocation6 + $0x38c] ss:$16 sps:$4 sm:$0xff]  }
 0x291   :  { %2142 = vmatprep.mubr.bf16.mxu0 %v1278_v22  ;;  %2224 = vmatprep.mubr.bf16.mxu1 %v1278_v22  ;;  %v3384_v22 = vld [vmem:[#allocation6 + $0x3a0] ss:$16 sps:$4 sm:$0xff]   ;;  %v3431_v5 = vld [vmem:[#allocation7 + $0xf8] sm:$0xff]  }
 0x292   :  { %2112 = vmatprep.subr.bf16.mxu0 %v3314_v19  ;;  %2194 = vmatprep.subr.bf16.mxu1 %v3317_v20  ;;  %v3381_v19 = vld [vmem:[#allocation6 + $0x388] ss:$16 sps:$4 sm:$0xff]   ;;  %v3386_v20 = vld [vmem:[#allocation6 + $0x3a4] ss:$16 sps:$4 sm:$0xff]  }
 0x294   :  { %2113 = vmatpush1.bf16.msra.mxu0 %v3312_v24  ;;  %2195 = vmatpush1.bf16.msra.mxu1 %v3315_v25  ;;  %v3387_v24 = vld [vmem:[#allocation6 + $0x3a8] ss:$16 sps:$4 sm:$0xff]   ;;  %v3392_v25 = vld [vmem:[#allocation6 + $0x3c4] ss:$16 sps:$4 sm:$0xff]  }
 0x295   :  { %2114 = vmatprep.subr.bf16.mxu0 %v3320_v8  ;;  %2196 = vmatprep.subr.bf16.mxu1 %v3323_v26  ;;  %v3395_v8 = vld [vmem:[#allocation6 + $0x3cc] ss:$16 sps:$4 sm:$0xff]  }
 0x298   :  { %2115 = vmatpush1.bf16.msra.mxu0 %v3318_v28  ;;  %2197 = vmatpush1.bf16.msra.mxu1 %v3321_v29  ;;  %v3390_v28 = vld [vmem:[#allocation6 + $0x3c0] ss:$16 sps:$4 sm:$0xff]   ;;  %v3393_v29 = vld [vmem:[#allocation6 + $0x3c8] ss:$16 sps:$4 sm:$0xff]  }
 0x299   :  { %2116 = vmatprep.subr.bf16.mxu0 %v3326_v30  ;;  %2198 = vmatprep.subr.bf16.mxu1 %v3329_v31  ;;  %v3398_v31 = vld [vmem:[#allocation6 + $0x3e4] ss:$16 sps:$4 sm:$0xff]  }
 0x29a   :  { %v3465_v26 = vpop.eup %3464 }
 0x29b   :  { %v1269_v30 = vmul.f32 %v3465_v26, %v1257_v63  ;;  %v3426_v63 = vld [vmem:[#allocation7 + $0x70] sm:$0xff]  }
 0x29c   :  { %2117 = vmatpush1.bf16.msra.mxu0 %v3324_v33  ;;  %2199 = vmatpush1.bf16.msra.mxu1 %v3327_v35  ;;  %v3396_v33 = vld [vmem:[#allocation6 + $0x3e0] ss:$16 sps:$4 sm:$0xff]   ;;  %v3399_v35 = vld [vmem:[#allocation6 + $0x3e8] ss:$16 sps:$4 sm:$0xff]  }
 0x29d   :  { %2118 = vmatprep.subr.bf16.mxu0 %v3332_v36  ;;  %2200 = vmatprep.subr.bf16.mxu1 %v3335_v37  ;;  %v1273_v36 = vmul.f32 %v3768_v27, %v1269_v30  ;;  %v3410_v27 = vld [vmem:[#allocation7 + $0x50] sm:$0xff]  }
 0x29f   :  { %v1277_v37 = vpack.c.bf16 %v1273_v36, %v1273_v36 }
 0x2a0   :  { %2119 = vmatpush1.bf16.msra.mxu0 %v3330_v38  ;;  %2201 = vmatpush1.bf16.msra.mxu1 %v3333_v39  ;;  %v3403_v38 = vld [vmem:[#allocation7 + $0xc0] sm:$0xff]  }
 0x2a1   :  { %2120 = vmatprep.subr.bf16.mxu0 %v3338_v40  ;;  %2202 = vmatprep.subr.bf16.mxu1 %v3341_v41  ;;  %v3404_v39 = vld [vmem:[#allocation7] sm:$0xff]   ;;  %v3406_v41 = vld [vmem:[#allocation7 + $0x48] sm:$0xff]  }
 0x2a2   :  { %v3405_v40 = vld [vmem:[#allocation7 + $0x80] sm:$0xff]  }
 0x2a4   :  { %2121 = vmatpush1.bf16.msra.mxu0 %v3336_v42  ;;  %2203 = vmatpush1.bf16.msra.mxu1 %v3339_v43  ;;  %v3407_v42 = vld [vmem:[#allocation7 + $0xc8] sm:$0xff]  }
 0x2a5   :  { %2122 = vmatprep.subr.bf16.mxu0 %v3344_v44  ;;  %2204 = vmatprep.subr.bf16.mxu1 %v3347_v45  ;;  %v3408_v43 = vld [vmem:[#allocation7 + $0x8] sm:$0xff]   ;;  %v3411_v45 = vld [vmem:[#allocation7 + $0xd0] sm:$0xff]  }
 0x2a6   :  { %v3409_v44 = vld [vmem:[#allocation7 + $0x88] sm:$0xff]  }
 0x2a8   :  { %2123 = vmatpush1.bf16.msra.mxu0 %v3342_v46  ;;  %2205 = vmatpush1.bf16.msra.mxu1 %v3345_v47  ;;  %v3412_v46 = vld [vmem:[#allocation7 + $0x10] sm:$0xff]  }
 0x2a9   :  { %2124 = vmatprep.subr.bf16.mxu0 %v3350_v48  ;;  %2206 = vmatprep.subr.bf16.mxu1 %v3353_v49  ;;  %v3413_v47 = vld [vmem:[#allocation7 + $0x90] sm:$0xff]   ;;  %v3414_v48 = vld [vmem:[#allocation7 + $0x58] sm:$0xff]  }
 0x2aa   :  { %v3415_v49 = vld [vmem:[#allocation7 + $0xd8] sm:$0xff]  }
 0x2ac   :  { %2125 = vmatpush1.bf16.msra.mxu0 %v3348_v50  ;;  %2207 = vmatpush1.bf16.msra.mxu1 %v3351_v51  ;;  %v3416_v50 = vld [vmem:[#allocation7 + $0x18] sm:$0xff]  }
 0x2ad   :  { %2126 = vmatprep.subr.bf16.mxu0 %v3356_v53  ;;  %2208 = vmatprep.subr.bf16.mxu1 %v3359_v54  ;;  %v3417_v51 = vld [vmem:[#allocation7 + $0x98] sm:$0xff]   ;;  %v3419_v53 = vld [vmem:[#allocation7 + $0xe0] sm:$0xff]  }
 0x2ae   :  { %v3420_v54 = vld [vmem:[#allocation7 + $0x20] sm:$0xff]  }
 0x2b0   :  { %2127 = vmatpush1.bf16.msra.mxu0 %v3354_v56  ;;  %2209 = vmatpush1.bf16.msra.mxu1 %v3357_v58  ;;  %v3422_v56 = vld [vmem:[#allocation7 + $0x68] sm:$0xff]  }
 0x2b1   :  { %2128 = vmatprep.subr.bf16.mxu0 %v3362_v60  ;;  %2210 = vmatprep.subr.bf16.mxu1 %v3365_v61  ;;  %v3423_v58 = vld [vmem:[#allocation7 + $0xe8] sm:$0xff]  }
 0x2b2   :  { %v3424_v60 = vld [vmem:[#allocation7 + $0x28] sm:$0xff]  }
 0x2b3   :  { %v3425_v61 = vld [vmem:[#allocation7 + $0xa8] sm:$0xff]  }
 0x2b4   :  { %2129 = vmatpush1.bf16.msra.mxu0 %v3360_v0  ;;  %2211 = vmatpush1.bf16.msra.mxu1 %v3363_v1  ;;  %v3427_v0 = vld [vmem:[#allocation7 + $0xf0] sm:$0xff]  }
 0x2b5   :  { %2130 = vmatprep.subr.bf16.mxu0 %v3368_v2  ;;  %2212 = vmatprep.subr.bf16.mxu1 %v3371_v4  ;;  %v3428_v1 = vld [vmem:[#allocation7 + $0x30] sm:$0xff]   ;;  %v3430_v4 = vld [vmem:[#allocation7 + $0x78] sm:$0xff]  }
 0x2b6   :  { %v3429_v2 = vld [vmem:[#allocation7 + $0xb0] sm:$0xff]  }
 0x2b8   :  { %2131 = vmatpush1.bf16.msra.mxu0 %v3366_v6  ;;  %2213 = vmatpush1.bf16.msra.mxu1 %v3369_v7  ;;  %v3432_v6 = vld [vmem:[#allocation7 + $0x38] sm:$0xff]  }
 0x2b9   :  { %2132 = vmatprep.subr.bf16.mxu0 %v3374_v9  ;;  %2214 = vmatprep.subr.bf16.mxu1 %v3377_v10  ;;  %v3433_v7 = vld [vmem:[#allocation7 + $0xb8] sm:$0xff]   ;;  %v1407_v9 = vld [vmem:[%s3795_s6] sm:$0xf] }
 0x2ba   :  { %v1412_v10 = vrot.slane %v1407_v9, %v3711_v14 }
 0x2bc   :  { %2133 = vmatpush1.bf16.msra.mxu0 %v3372_v11  ;;  %2215 = vmatpush1.bf16.msra.mxu1 %v3375_v12  ;;  %v1420_v11 = vrot.slane %v1407_v9, %v3728_v57  ;;  %v1416_v12 = vrot.slane %v1407_v9, %v3718_v16 }
 0x2bd   :  { %2134 = vmatprep.subr.bf16.mxu0 %v3380_v13  ;;  %2216 = vmatprep.subr.bf16.mxu1 %v3383_v15  ;;  %v1424_v13 = vrot.slane %v1407_v9, %v3722_v18 }
 0x2c0   :  { %2135 = vmatpush1.bf16.msra.mxu0 %v3378_v17  ;;  %2217 = vmatpush1.bf16.msra.mxu1 %v3381_v19 }
 0x2c1   :  { %2136 = vmatprep.subr.bf16.mxu0 %v3386_v20  ;;  %2218 = vmatprep.subr.bf16.mxu1 %v3389_v21 }
 0x2c4   :  { %2137 = vmatpush1.bf16.msra.mxu0 %v3384_v22  ;;  %2219 = vmatpush1.bf16.msra.mxu1 %v3387_v24 }
 0x2c5   :  { %2138 = vmatprep.subr.bf16.mxu0 %v3392_v25  ;;  %2220 = vmatprep.subr.bf16.mxu1 %v3395_v8 }
 0x2c8   :  { %2139 = vmatpush1.bf16.msra.mxu0 %v3390_v28  ;;  %2221 = vmatpush1.bf16.msra.mxu1 %v3393_v29 }
 0x2c9   :  { %2140 = vmatprep.subr.bf16.mxu0 %v3398_v31  ;;  %2222 = vmatprep.subr.bf16.mxu1 %v3401_v32 }
 0x2cc   :  { %2141 = vmatpush1.bf16.msra.mxu0 %v3396_v33  ;;  %2223 = vmatpush1.bf16.msra.mxu1 %v3399_v35 }
 0x2cd   :  { %2929 = vmatprep.subr.bf16.mxu0 %v3402_v34  ;;  %2951 = vmatprep.subr.bf16.mxu1 %v3403_v38 }
 0x2cf   :  { %2143 = vmatmul.mubr.bf16.vlgmr.msra.gmra.mrb[8].mxu0 %v1277_v37  ;;  %2225 = vmatmul.mubr.bf16.vlgmr.msra.gmra.mrb[8].mxu1 %v1277_v37 }
 0x2d0   :  { %2930 = vmatpush3.bf16.msra.mxu0 %v3404_v39  ;;  %2952 = vmatpush3.bf16.msra.mxu1 %v3405_v40 }
 0x2d1   :  { %2931 = vmatprep.subr.bf16.mxu0 %v3406_v41  ;;  %2953 = vmatprep.subr.bf16.mxu1 %v3407_v42 }
 0x2d4   :  { %2932 = vmatpush3.bf16.msra.mxu0 %v3408_v43  ;;  %2954 = vmatpush3.bf16.msra.mxu1 %v3409_v44 }
 0x2d5   :  { %2933 = vmatprep.subr.bf16.mxu0 %v3410_v27  ;;  %2955 = vmatprep.subr.bf16.mxu1 %v3411_v45 }
 0x2d8   :  { %2934 = vmatpush3.bf16.msra.mxu0 %v3412_v46  ;;  %2956 = vmatpush3.bf16.msra.mxu1 %v3413_v47 }
 0x2d9   :  { %2935 = vmatprep.subr.bf16.mxu0 %v3414_v48  ;;  %2957 = vmatprep.subr.bf16.mxu1 %v3415_v49 }
 0x2dc   :  { %2936 = vmatpush3.bf16.msra.mxu0 %v3416_v50  ;;  %2958 = vmatpush3.bf16.msra.mxu1 %v3417_v51 }
 0x2dd   :  { %2937 = vmatprep.subr.bf16.mxu0 %v3418_v52  ;;  %2959 = vmatprep.subr.bf16.mxu1 %v3419_v53 }
 0x2e0   :  { %2938 = vmatpush3.bf16.msra.mxu0 %v3420_v54  ;;  %2960 = vmatpush3.bf16.msra.mxu1 %v3421_v55 }
 0x2e1   :  { %2939 = vmatprep.subr.bf16.mxu0 %v3422_v56  ;;  %2961 = vmatprep.subr.bf16.mxu1 %v3423_v58 }
 0x2e4   :  { %2940 = vmatpush3.bf16.msra.mxu0 %v3424_v60  ;;  %2962 = vmatpush3.bf16.msra.mxu1 %v3425_v61 }
 0x2e5   :  { %2941 = vmatprep.subr.bf16.mxu0 %v3426_v63  ;;  %2963 = vmatprep.subr.bf16.mxu1 %v3427_v0 }
 0x2e8   :  { %2942 = vmatpush3.bf16.msra.mxu0 %v3428_v1  ;;  %2964 = vmatpush3.bf16.msra.mxu1 %v3429_v2 }
 0x2e9   :  { %2943 = vmatprep.subr.bf16.mxu0 %v3430_v4  ;;  %2965 = vmatprep.subr.bf16.mxu1 %v3431_v5 }
 0x2ec   :  { %2944 = vmatpush3.bf16.msra.mxu0 %v3432_v6  ;;  %2966 = vmatpush3.bf16.msra.mxu1 %v3433_v7 }
 0x3a2   :  { %v2144_v15 = vpop.f32.mrb[8].mxu0  ;;  %v2226_v17 = vpop.f32.mrb[8].mxu1 }
 0x3a3   :  { %v2977_v19 = vadd.f32 %v2144_v15, %v1412_v10  ;;  %v2979_v20 = vadd.f32 %v2226_v17, %v1420_v11  ;;  %v2146_v21 = vpop.f32.mrb[9].mxu0  ;;  %v2228_v22 = vpop.f32.mrb[9].mxu1 }
 0x3a4   :  { %v2978_v24 = vadd.f32 %v2146_v21, %v1416_v12  ;;  %v2980_v25 = vadd.f32 %v2228_v22, %v1424_v13  ;;  %v2148_v8 = vpop.f32.mrb[10].mxu0  ;;  %v2230_v26 = vpop.f32.mrb[10].mxu1  ;;  %v2896_v12 = vld [vmem:[%s3797_s8] ss:$0 sm:$0xff] }
 0x3a5   :  { %v2233_v28 = vmin.f32 %v2977_v19, 20.0  ;;  %v2235_v29 = vmin.f32 %v2979_v20, 20.0  ;;  %v2149_v30 = vpop.f32.mrb[11].mxu0  ;;  %v2231_v14 = vpop.f32.mrb[11].mxu1 }
 0x3a6   :  { %v2234_v31 = vmin.f32 %v2978_v24, 20.0  ;;  %v2236_v57 = vmin.f32 %v2980_v25, 20.0 }
 0x3a7   :  { %v2237_v32 = vmul.f32 1.442695, %v2233_v28  ;;  %v2241_v16 = vmul.f32 1.442695, %v2235_v29 }
 0x3a8   :  { %v2239_v33 = vmul.f32 1.442695, %v2234_v31  ;;  %v2243_v18 = vmul.f32 1.442695, %v2236_v57 }
 0x3a9   :  { %3466 = vpow2.f32 %v2237_v32 }
 0x3aa   :  { %3468 = vpow2.f32 %v2241_v16 }
 0x3ab   :  { %3470 = vpow2.f32 %v2239_v33 }
 0x3ac   :  { %3472 = vpow2.f32 %v2243_v18 }
 0x3b3   :  { %v3467_v35 = vpop.eup %3466 }
 0x3b4   :  { %v3469_v36 = vpop.eup %3468  ;;  %v2245_v37 = vadd.f32 2.0, %v3467_v35 }
 0x3b5   :  { %v3471_v34 = vpop.eup %3470  ;;  %v2247_v38 = vadd.f32 2.0, %v3469_v36 }
 0x3b6   :  { %v3473_v39 = vpop.eup %3472  ;;  %v2249_v40 = vmul.f32 %v3467_v35, %v2245_v37  ;;  %v2246_v41 = vadd.f32 2.0, %v3471_v34 }
 0x3b7   :  { %v2251_v42 = vmul.f32 %v3469_v36, %v2247_v38  ;;  %v2248_v43 = vadd.f32 2.0, %v3473_v39 }
 0x3b8   :  { %v2253_v44 = vadd.f32 2.0, %v2249_v40  ;;  %v2250_v27 = vmul.f32 %v3471_v34, %v2246_v41 }
 0x3b9   :  { %v2255_v45 = vadd.f32 2.0, %v2251_v42  ;;  %v2252_v46 = vmul.f32 %v3473_v39, %v2248_v43 }
 0x3ba   :  { %3474 = vrcp.f32 %v2253_v44  ;;  %v2254_v47 = vadd.f32 2.0, %v2250_v27 }
 0x3bb   :  { %3476 = vrcp.f32 %v2255_v45  ;;  %v2256_v48 = vadd.f32 2.0, %v2252_v46 }
 0x3bc   :  { %3478 = vrcp.f32 %v2254_v47 }
 0x3bd   :  { %3480 = vrcp.f32 %v2256_v48 }
 0x3c4   :  { %v3475_v49 = vpop.eup %3474 }
 0x3c5   :  { %v3477_v50 = vpop.eup %3476  ;;  %v2261_v51 = vmul.f32 %v3475_v49, %v2249_v40 }
 0x3c6   :  { %v3479_v52 = vpop.eup %3478  ;;  %v2263_v53 = vmul.f32 %v3477_v50, %v2251_v42 }
 0x3c7   :  { %v3481_v54 = vpop.eup %3480  ;;  %v2265_v55 = vmul.f32 %v2977_v19, %v2261_v51  ;;  %v2262_v56 = vmul.f32 %v3479_v52, %v2250_v27 }
 0x3c8   :  { %v2267_v58 = vmul.f32 %v2979_v20, %v2263_v53  ;;  %v2264_v60 = vmul.f32 %v3481_v54, %v2252_v46 }
 0x3c9   :  { %v2266_v61 = vmul.f32 %v2978_v24, %v2262_v56  ;;  %v2269_v63 = vpack.c.bf16 %v2265_v55, %v2265_v55 }
 0x3ca   :  { %v2268_v0 = vmul.f32 %v2980_v25, %v2264_v60  ;;  %v2271_v1 = vpack.c.bf16 %v2267_v58, %v2267_v58 }
 0x3cb   :  { %v2270_v2 = vpack.c.bf16 %v2266_v61, %v2266_v61  ;;  %v2273_v6 = vadd.bf16 %v2269_v63, %v3732_v62 }
 0x3cc   :  { %v2272_v4 = vpack.c.bf16 %v2268_v0, %v2268_v0  ;;  %v2275_v9 = vadd.bf16 %v2271_v1, %v3748_v23 }
 0x3cd   :  { %v2274_v5 = vadd.bf16 %v2270_v2, %v3730_v59 }
 0x3ce   :  { %v2276_v7 = vadd.bf16 %v2272_v4, %v3738_v3 }
 0x3cf   :  { %2572 = vmatprep.mubr.bf16.mxu0 %v2274_v5 }
 0x3d0   :  { %2612 = vmatprep.mubr.bf16.mxu1 %v2276_v7  ;;  %2573 = vmatmul.mubr.bf16.vlgmr.msra.gmra.mrb[12].mxu0 %v2273_v6 }
 0x3d1   :  { %2613 = vmatmul.mubr.bf16.vlgmr.msra.gmra.mrb[12].mxu1 %v2275_v9 }
 0x4a3   :  { %v2945_v10 = vpop.f32.mrb[12].mxu0 }
 0x4a4   :  { %v2967_v11 = vpop.f32.mrb[12].mxu1  ;;  %v2946_v13 = vpop.f32.mrb[13].mxu0 }
 0x4a5   :  { %v2947_v15 = vadd.f32 %v2946_v13, %v2945_v10  ;;  %v2968_v17 = vpop.f32.mrb[13].mxu1  ;;  %v2948_v59 = vpop.f32.mrb[14].mxu0 }
 0x4a6   :  { %v2969_v19 = vadd.f32 %v2968_v17, %v2967_v11  ;;  %v2970_v62 = vpop.f32.mrb[14].mxu1  ;;  %v2949_v20 = vpop.f32.mrb[15].mxu0 }
 0x4a7   :  { %v2575_v3 = vadd.f32 %v2947_v15, %v2896_v12  ;;  %v2971_v21 = vpop.f32.mrb[15].mxu1 }
 0x4a9   :  { %v2615_v23 = vadd.f32 %v2969_v19, %v2575_v3 }
 0x4ab   :  { %3482 = vtanh.f32 %v2615_v23 }
 0x4b5   :  { %v3483_v22 = vpop.eup %3482 }
 0x4b6   :  { %v2621_v24 = vpack.c.bf16 %v3483_v22, %v3483_v22 }
 0x4b8   :  { %2622 = vst [vmem:[%s3798_s9] sm:$0xf] %v2621_v24 }
 0x4b9   :  { %2627 = vsyncpa [#allocation3], 1 }
 0x4ba   :  { %2628 = vsyncpa [#allocation5], 1 }
 0x4bb   :  { %2629 = vsyncpa [#allocation8], 1 }

</bundles_post_ra>
